<compile_context>
chip_gen: v7x
topology: tpu7x:2x2x1
jax: 0.10.0
libtpu: 0.0.40
codegen_flags: <defaults>
</compile_context>

<pallas_src>
import jax
import jax.numpy as jnp
from jax.experimental import pallas as pl
from jax.experimental.pallas import tpu as pltpu


# ----------------------------------------------------------------------------
# Fused Pallas kernel: all LSTM layers + merged decoder in one invocation.
# ----------------------------------------------------------------------------
def make_fused_kernel(T, Bp, H, n_layers):
    """Returns a kernel:
        kernel(seq_ref, h0_ref, c0_ref,
               wih_0, whh_0, b_0, ..., wih_{L-1}, whh_{L-1}, b_{L-1},
               wdec, bdec,
               dec_out_ref, h_out_ref, c_out_ref)
    Everything lives in VMEM; the time loop is a statically unrolled loop
    (T is small), so all per-step slices are static and sublane-aligned.
    """

    def kernel(seq_ref, h0_ref, c0_ref, *rest):
        nw = 3 * n_layers + 2
        w_refs = rest[:nw]
        dec_out_ref, h_out_ref, c_out_ref = rest[nw], rest[nw + 1], rest[nw + 2]

        src = seq_ref[...]                                   # (T*Bp, D_in)

        for layer in range(n_layers):
            wih = w_refs[3 * layer][...]                     # (D_in, 4H)
            whh = w_refs[3 * layer + 1][...]                 # (H, 4H)
            bias = w_refs[3 * layer + 2][...]                # (1, 4H)

            # Hoisted input projection: one big matmul for all timesteps.
            gx = jnp.dot(src, wih,
                         preferred_element_type=jnp.float32) + bias  # (T*Bp, 4H)

            h = h0_ref[layer]                                # (Bp, H)
            c = c0_ref[layer]                                # (Bp, H)
            outs = []

            # Serial recurrence: only h @ W_hh on the critical path.
            # Statically unrolled (T is small); slices are 8-row aligned.
            for t in range(T):
                g_t = gx[t * Bp:(t + 1) * Bp, :] + jnp.dot(
                    h, whh, preferred_element_type=jnp.float32)       # (Bp, 4H)

                # Full-tile transcendentals + lane-mask select (gate order
                # i, f, g, o — matches torch.nn.LSTM).
                sig = jax.nn.sigmoid(g_t)
                tah = jnp.tanh(g_t)
                lane = jax.lax.broadcasted_iota(jnp.int32, g_t.shape, 1)
                act = jnp.where((lane >= 2 * H) & (lane < 3 * H), tah, sig)

                i_g = act[:, 0 * H:1 * H]
                f_g = act[:, 1 * H:2 * H]
                g_g = act[:, 2 * H:3 * H]
                o_g = act[:, 3 * H:4 * H]

                c = f_g * c + i_g * g_g
                h = o_g * jnp.tanh(c)
                outs.append(h)

            h_out_ref[layer] = h
            c_out_ref[layer] = c
            # Hidden sequence stays on-chip; feeds next layer / decoder.
            src = jnp.concatenate(outs, axis=0)              # (T*Bp, H)

        # Merged decoder epilogue (lane-dense 128-wide store).
        wdec = w_refs[3 * n_layers][...]                     # (H, 128)
        bdec = w_refs[3 * n_layers + 1][...]                 # (1, 128)
        dec_out_ref[...] = (jnp.dot(src, wdec,
                                    preferred_element_type=jnp.float32)
                            + bdec)

    return kernel


# ----------------------------------------------------------------------------
# Parameter preprocessing (one-time: transposes, bias merge, decoder fusion)
# ----------------------------------------------------------------------------
def prepare_fused_params(params, cfg):
    E, H, L = cfg.embedding_dim, cfg.hidden_dim, cfg.n_layers
    layers = []
    for layer in range(L):
        w = params["lstm"][layer]
        layers.append(dict(
            wih_t=jnp.transpose(w["w_ih"]).astype(jnp.float32),     # (D, 4H)
            whh_t=jnp.transpose(w["w_hh"]).astype(jnp.float32),     # (H, 4H)
            bias=(w["b_ih"] + w["b_hh"]).reshape(1, 4 * H).astype(jnp.float32),
        ))

    npad = ((E + 2 + 127) // 128) * 128                              # lane-dense
    wdec = jnp.zeros((H, npad), jnp.float32)
    wdec = wdec.at[:, :E].set(jnp.transpose(params["dec_w"]))
    wdec = wdec.at[:, E:E + 2].set(jnp.transpose(params["dec_expl_w"]))
    bdec = jnp.zeros((1, npad), jnp.float32)
    bdec = bdec.at[:, :E].set(params["dec_b"])
    bdec = bdec.at[:, E:E + 2].set(params["dec_expl_b"])

    return {"layers": layers, "dec_w": wdec, "dec_b": bdec}


# ----------------------------------------------------------------------------
# Model
# ----------------------------------------------------------------------------
class Config:
    # cfg.LSTM.*
    n_loc_rank = 50
    n_loc_type = 10
    embedding_dim = 16
    hidden_dim = 32
    n_layers = 2
    # cfg.TRAIN.BATCH_SIZE
    batch_size = 4


def init_params(cfg, key):
    E, H, L = cfg.embedding_dim, cfg.hidden_dim, cfg.n_layers
    ks = iter(jax.random.split(key, 64))

    def normal(shape, scale=0.1):
        return scale * jax.random.normal(next(ks), shape, dtype=jnp.float32)

    p = {}
    p["weight_loss_w2v"] = jnp.ones((1,), jnp.float32)
    p["weight_expl"] = jnp.ones((1,), jnp.float32)
    p["weight_dist"] = jnp.ones((1,), jnp.float32)
    p["emb_rank"] = normal((cfg.n_loc_rank, E))
    p["emb_type"] = normal((cfg.n_loc_type, E))
    p["emb_pep"] = normal((860, E))
    p["emb_day"] = normal((8, E))
    p["emb_global"] = normal((34279, E))
    p["lstm"] = []
    for layer in range(L):
        d_in = (E + 3) if layer == 0 else H
        p["lstm"].append(dict(
            w_ih=normal((4 * H, d_in)),
            w_hh=normal((4 * H, H)),
            b_ih=normal((4 * H,)),
            b_hh=normal((4 * H,)),
        ))
    p["dec_w"] = normal((E, H))
    p["dec_b"] = normal((E,))
    p["dec_expl_w"] = normal((2, H))
    p["dec_expl_b"] = normal((2,))
    return p


def embeddings_input(params, x):
    # x: (F, T, B) float; integer-valued rows are cast for lookups.
    def take(table, row):
        return jnp.take(table, row.astype(jnp.int32), axis=0)   # (T, B, E)
    return (take(params["emb_rank"], x[0])
            + take(params["emb_type"], x[-1])
            + take(params["emb_pep"], x[5])
            + take(params["emb_day"], x[3])
            + take(params["emb_global"], x[8]))


def forward(params, fused, x, hidden, cfg):
    """Mirrors LSTM.forward: returns (logits, hidden, logits_expl)."""
    T, B = x.shape[1], x.shape[2]
    E, H, L = cfg.embedding_dim, cfg.hidden_dim, cfg.n_layers

    embeds = embeddings_input(params, x)                         # (T, B, E)
    extra = jnp.transpose(x[jnp.array([1, 2, 4])], (1, 2, 0)).astype(jnp.float32)
    seq = jnp.concatenate([embeds, extra], axis=2)               # (T, B, E+3)
    Din = seq.shape[-1]

    # Pad batch to a multiple of 8 sublanes (padding rows dropped at the end).
    Bp = ((B + 7) // 8) * 8
    seq_p = jnp.pad(seq, ((0, 0), (0, Bp - B), (0, 0)))
    seq_flat = seq_p.reshape(T * Bp, Din)

    h0, c0 = hidden                                              # (L, B, H)
    h0p = jnp.pad(h0, ((0, 0), (0, Bp - B), (0, 0)))
    c0p = jnp.pad(c0, ((0, 0), (0, Bp - B), (0, 0)))

    npad = fused["dec_w"].shape[1]
    flat_w = []
    for lw in fused["layers"]:
        flat_w += [lw["wih_t"], lw["whh_t"], lw["bias"]]
    flat_w += [fused["dec_w"], fused["dec_b"]]

    kernel = make_fused_kernel(T=T, Bp=Bp, H=H, n_layers=L)
    dec_out, hT, cT = pl.pallas_call(
        kernel,
        out_shape=(jax.ShapeDtypeStruct((T * Bp, npad), jnp.float32),
                   jax.ShapeDtypeStruct((L, Bp, H), jnp.float32),
                   jax.ShapeDtypeStruct((L, Bp, H), jnp.float32)),
    )(seq_flat, h0p, c0p, *flat_w)

    dec_out = dec_out.reshape(T, Bp, npad)
    logits = dec_out[:, :B, :E]                                  # (T, B, E)
    logits_expl = dec_out[:, :B, E:E + 2]                        # (T, B, 2)
    new_hidden = (hT[:, :B], cT[:, :B])
    # repackage_hidden (detach) is a no-op in this functional JAX setting.
    return logits, new_hidden, logits_expl


# ----------------------------------------------------------------------------
# Pure-JAX reference (for correctness check)
# ----------------------------------------------------------------------------
def lstm_layer_ref(x_seq, w_ih, w_hh, b_ih, b_hh, h0, c0):
    def step(carry, x_t):
        h, c = carry
        gates = x_t @ w_ih.T + h @ w_hh.T + b_ih + b_hh
        i, f, g, o = jnp.split(gates, 4, axis=-1)
        i, f, o = jax.nn.sigmoid(i), jax.nn.sigmoid(f), jax.nn.sigmoid(o)
        g = jnp.tanh(g)
        c = f * c + i * g
        h = o * jnp.tanh(c)
        return (h, c), h
    (hT, cT), out = jax.lax.scan(step, (h0, c0), x_seq)
    return out, hT, cT


def forward_ref(params, x, hidden, cfg):
    E, H, L = cfg.embedding_dim, cfg.hidden_dim, cfg.n_layers
    embeds = embeddings_input(params, x)
    extra = jnp.transpose(x[jnp.array([1, 2, 4])], (1, 2, 0)).astype(jnp.float32)
    seq = jnp.concatenate([embeds, extra], axis=2)
    h0, c0 = hidden
    h_fin, c_fin = [], []
    layer_in = seq
    for layer in range(L):
        w = params["lstm"][layer]
        layer_in, hT, cT = lstm_layer_ref(layer_in, w["w_ih"], w["w_hh"],
                                          w["b_ih"], w["b_hh"],
                                          h0[layer], c0[layer])
        h_fin.append(hT)
        c_fin.append(cT)
    logits = layer_in @ params["dec_w"].T + params["dec_b"]
    logits_expl = layer_in @ params["dec_expl_w"].T + params["dec_expl_b"]
    return logits, (jnp.stack(h_fin), jnp.stack(c_fin)), logits_expl


# ----------------------------------------------------------------------------
# Main
# ----------------------------------------------------------------------------
if __name__ == "__main__":
    cfg = Config()
    T, B = 8, cfg.batch_size
    F = 10  # feature rows; x[-1] == x[9]

    key = jax.random.PRNGKey(0)
    k_param, k_idx, k_flt = jax.random.split(key, 3)
    params = init_params(cfg, k_param)
    fused = prepare_fused_params(params, cfg)   # one-time weight preprocessing

    # Build x: (F, T, B), float32; integer-valued rows for embedding lookups.
    ki = iter(jax.random.split(k_idx, 8))
    x = jnp.zeros((F, T, B), jnp.float32)
    x = x.at[0].set(jax.random.randint(next(ki), (T, B), 0, cfg.n_loc_rank).astype(jnp.float32))
    x = x.at[3].set(jax.random.randint(next(ki), (T, B), 0, 8).astype(jnp.float32))
    x = x.at[5].set(jax.random.randint(next(ki), (T, B), 0, 860).astype(jnp.float32))
    x = x.at[8].set(jax.random.randint(next(ki), (T, B), 0, 34279).astype(jnp.float32))
    x = x.at[9].set(jax.random.randint(next(ki), (T, B), 0, cfg.n_loc_type).astype(jnp.float32))
    kf = iter(jax.random.split(k_flt, 4))
    for row in (1, 2, 4):
        x = x.at[row].set(jax.random.uniform(next(kf), (T, B), jnp.float32))

    hidden0 = (jnp.zeros((cfg.n_layers, B, cfg.hidden_dim), jnp.float32),
               jnp.zeros((cfg.n_layers, B, cfg.hidden_dim), jnp.float32))

    # Jit the whole forward so embedding gathers + padding + the fused Pallas
    # kernel dispatch as a single program.
    fwd = jax.jit(lambda p, f, xx, h: forward(p, f, xx, h, cfg))
    logits, hidden, logits_expl = fwd(params, fused, x, hidden0)
    jax.block_until_ready((logits, hidden, logits_expl))

    # Sanity check against pure-JAX reference.
    r_logits, r_hidden, r_expl = forward_ref(params, x, hidden0, cfg)
    assert logits.shape == (T, B, cfg.embedding_dim)
    assert logits_expl.shape == (T, B, 2)
    assert hidden[0].shape == (cfg.n_layers, B, cfg.hidden_dim)
    assert jnp.allclose(logits, r_logits, atol=1e-3, rtol=1e-3)
    assert jnp.allclose(logits_expl, r_expl, atol=1e-3, rtol=1e-3)
    assert jnp.allclose(hidden[0], r_hidden[0], atol=1e-3, rtol=1e-3)
    assert jnp.allclose(hidden[1], r_hidden[1], atol=1e-3, rtol=1e-3)

    print("KERNEL_OK")
</pallas_src>

<mosaic_0001>
module attributes {stable_mosaic.version = 11 : i64} {
  func.func @kernel(%arg0: memref<64x19xf32, #tpu.memory_space<vmem>>, %arg1: memref<2x8x32xf32, #tpu.memory_space<vmem>>, %arg2: memref<2x8x32xf32, #tpu.memory_space<vmem>>, %arg3: memref<19x128xf32, #tpu.memory_space<vmem>>, %arg4: memref<32x128xf32, #tpu.memory_space<vmem>>, %arg5: memref<1x128xf32, #tpu.memory_space<vmem>>, %arg6: memref<32x128xf32, #tpu.memory_space<vmem>>, %arg7: memref<32x128xf32, #tpu.memory_space<vmem>>, %arg8: memref<1x128xf32, #tpu.memory_space<vmem>>, %arg9: memref<32x128xf32, #tpu.memory_space<vmem>>, %arg10: memref<1x128xf32, #tpu.memory_space<vmem>>, %arg11: memref<64x128xf32, #tpu.memory_space<vmem>>, %arg12: memref<2x8x32xf32, #tpu.memory_space<vmem>>, %arg13: memref<2x8x32xf32, #tpu.memory_space<vmem>>) attributes {dimension_semantics = [], scalar_prefetch = 0 : i64, scratch_operands = 0 : i64, tpu.core_type = #tpu.core_type<tc>} {
    %c0 = arith.constant 0 : index
    %c0_0 = arith.constant 0 : index
    %0 = vector.load %arg0[%c0, %c0_0] : memref<64x19xf32, #tpu.memory_space<vmem>>, vector<64x19xf32>
    %c0_1 = arith.constant 0 : index
    %c0_2 = arith.constant 0 : index
    %1 = vector.load %arg3[%c0_1, %c0_2] : memref<19x128xf32, #tpu.memory_space<vmem>>, vector<19x128xf32>
    %c0_3 = arith.constant 0 : index
    %c0_4 = arith.constant 0 : index
    %2 = vector.load %arg4[%c0_3, %c0_4] : memref<32x128xf32, #tpu.memory_space<vmem>>, vector<32x128xf32>
    %c0_5 = arith.constant 0 : index
    %c0_6 = arith.constant 0 : index
    %3 = vector.load %arg5[%c0_5, %c0_6] : memref<1x128xf32, #tpu.memory_space<vmem>>, vector<1x128xf32>
    %cst = arith.constant dense<0.000000e+00> : vector<64x128xf32>
    %4 = tpu.matmul %0, %1, %cst {dimension_numbers = #tpu.dot_dimension_numbers<[1], [0], [0], [1], [0, 0, 1, 1], [], []>} : vector<64x19xf32>, vector<19x128xf32>, vector<64x128xf32> -> vector<64x128xf32>
    %5 = vector.broadcast %3 : vector<1x128xf32> to vector<64x128xf32>
    %6 = arith.addf %4, %5 : vector<64x128xf32>
    %c0_7 = arith.constant 0 : index
    %c0_8 = arith.constant 0 : index
    %c0_9 = arith.constant 0 : index
    %7 = vector.load %arg1[%c0_7, %c0_8, %c0_9] : memref<2x8x32xf32, #tpu.memory_space<vmem>>, vector<1x8x32xf32>
    %8 = vector.shape_cast %7 : vector<1x8x32xf32> to vector<8x32xf32>
    %c0_10 = arith.constant 0 : index
    %c0_11 = arith.constant 0 : index
    %c0_12 = arith.constant 0 : index
    %9 = vector.load %arg2[%c0_10, %c0_11, %c0_12] : memref<2x8x32xf32, #tpu.memory_space<vmem>>, vector<1x8x32xf32>
    %10 = vector.shape_cast %9 : vector<1x8x32xf32> to vector<8x32xf32>
    %11 = vector.extract_strided_slice %6 {offsets = [0, 0], sizes = [8, 128], strides = [1, 1]} : vector<64x128xf32> to vector<8x128xf32>
    %cst_13 = arith.constant dense<0.000000e+00> : vector<8x128xf32>
    %12 = tpu.matmul %8, %2, %cst_13 {dimension_numbers = #tpu.dot_dimension_numbers<[1], [0], [0], [1], [0, 0, 1, 1], [], []>} : vector<8x32xf32>, vector<32x128xf32>, vector<8x128xf32> -> vector<8x128xf32>
    %13 = arith.addf %11, %12 : vector<8x128xf32>
    %14 = arith.negf %13 : vector<8x128xf32>
    %15 = math.exp %14 : vector<8x128xf32>
    %cst_14 = arith.constant 1.000000e+00 : f32
    %16 = vector.broadcast %cst_14 : f32 to vector<8x128xf32>
    %17 = arith.addf %16, %15 : vector<8x128xf32>
    %18 = arith.divf %16, %17 : vector<8x128xf32>
    %19 = math.tanh %13 : vector<8x128xf32>
    %20 = tpu.iota {dimensions = array<i32: 1>} : vector<8x128xi32>
    %c64_i32 = arith.constant 64 : i32
    %21 = vector.broadcast %c64_i32 : i32 to vector<8x128xi32>
    %22 = arith.cmpi sge, %20, %21 : vector<8x128xi32>
    %c96_i32 = arith.constant 96 : i32
    %23 = vector.broadcast %c96_i32 : i32 to vector<8x128xi32>
    %24 = arith.cmpi slt, %20, %23 : vector<8x128xi32>
    %25 = arith.andi %22, %24 : vector<8x128xi1>
    %26 = arith.select %25, %19, %18 : vector<8x128xi1>, vector<8x128xf32>
    %27 = vector.extract_strided_slice %26 {offsets = [0, 0], sizes = [8, 32], strides = [1, 1]} : vector<8x128xf32> to vector<8x32xf32>
    %28 = vector.extract_strided_slice %26 {offsets = [0, 32], sizes = [8, 32], strides = [1, 1]} : vector<8x128xf32> to vector<8x32xf32>
    %29 = vector.extract_strided_slice %26 {offsets = [0, 64], sizes = [8, 32], strides = [1, 1]} : vector<8x128xf32> to vector<8x32xf32>
    %30 = vector.extract_strided_slice %26 {offsets = [0, 96], sizes = [8, 32], strides = [1, 1]} : vector<8x128xf32> to vector<8x32xf32>
    %31 = arith.mulf %28, %10 : vector<8x32xf32>
    %32 = arith.mulf %27, %29 : vector<8x32xf32>
    %33 = arith.addf %31, %32 : vector<8x32xf32>
    %34 = math.tanh %33 : vector<8x32xf32>
    %35 = arith.mulf %30, %34 : vector<8x32xf32>
    %36 = vector.extract_strided_slice %6 {offsets = [8, 0], sizes = [8, 128], strides = [1, 1]} : vector<64x128xf32> to vector<8x128xf32>
    %cst_15 = arith.constant dense<0.000000e+00> : vector<8x128xf32>
    %37 = tpu.matmul %35, %2, %cst_15 {dimension_numbers = #tpu.dot_dimension_numbers<[1], [0], [0], [1], [0, 0, 1, 1], [], []>} : vector<8x32xf32>, vector<32x128xf32>, vector<8x128xf32> -> vector<8x128xf32>
    %38 = arith.addf %36, %37 : vector<8x128xf32>
    %39 = arith.negf %38 : vector<8x128xf32>
    %40 = math.exp %39 : vector<8x128xf32>
    %cst_16 = arith.constant 1.000000e+00 : f32
    %41 = vector.broadcast %cst_16 : f32 to vector<8x128xf32>
    %42 = arith.addf %41, %40 : vector<8x128xf32>
    %43 = arith.divf %41, %42 : vector<8x128xf32>
    %44 = math.tanh %38 : vector<8x128xf32>
    %45 = tpu.iota {dimensions = array<i32: 1>} : vector<8x128xi32>
    %c64_i32_17 = arith.constant 64 : i32
    %46 = vector.broadcast %c64_i32_17 : i32 to vector<8x128xi32>
    %47 = arith.cmpi sge, %45, %46 : vector<8x128xi32>
    %c96_i32_18 = arith.constant 96 : i32
    %48 = vector.broadcast %c96_i32_18 : i32 to vector<8x128xi32>
    %49 = arith.cmpi slt, %45, %48 : vector<8x128xi32>
    %50 = arith.andi %47, %49 : vector<8x128xi1>
    %51 = arith.select %50, %44, %43 : vector<8x128xi1>, vector<8x128xf32>
    %52 = vector.extract_strided_slice %51 {offsets = [0, 0], sizes = [8, 32], strides = [1, 1]} : vector<8x128xf32> to vector<8x32xf32>
    %53 = vector.extract_strided_slice %51 {offsets = [0, 32], sizes = [8, 32], strides = [1, 1]} : vector<8x128xf32> to vector<8x32xf32>
    %54 = vector.extract_strided_slice %51 {offsets = [0, 64], sizes = [8, 32], strides = [1, 1]} : vector<8x128xf32> to vector<8x32xf32>
    %55 = vector.extract_strided_slice %51 {offsets = [0, 96], sizes = [8, 32], strides = [1, 1]} : vector<8x128xf32> to vector<8x32xf32>
    %56 = arith.mulf %53, %33 : vector<8x32xf32>
    %57 = arith.mulf %52, %54 : vector<8x32xf32>
    %58 = arith.addf %56, %57 : vector<8x32xf32>
    %59 = math.tanh %58 : vector<8x32xf32>
    %60 = arith.mulf %55, %59 : vector<8x32xf32>
    %61 = vector.extract_strided_slice %6 {offsets = [16, 0], sizes = [8, 128], strides = [1, 1]} : vector<64x128xf32> to vector<8x128xf32>
    %cst_19 = arith.constant dense<0.000000e+00> : vector<8x128xf32>
    %62 = tpu.matmul %60, %2, %cst_19 {dimension_numbers = #tpu.dot_dimension_numbers<[1], [0], [0], [1], [0, 0, 1, 1], [], []>} : vector<8x32xf32>, vector<32x128xf32>, vector<8x128xf32> -> vector<8x128xf32>
    %63 = arith.addf %61, %62 : vector<8x128xf32>
    %64 = arith.negf %63 : vector<8x128xf32>
    %65 = math.exp %64 : vector<8x128xf32>
    %cst_20 = arith.constant 1.000000e+00 : f32
    %66 = vector.broadcast %cst_20 : f32 to vector<8x128xf32>
    %67 = arith.addf %66, %65 : vector<8x128xf32>
    %68 = arith.divf %66, %67 : vector<8x128xf32>
    %69 = math.tanh %63 : vector<8x128xf32>
    %70 = tpu.iota {dimensions = array<i32: 1>} : vector<8x128xi32>
    %c64_i32_21 = arith.constant 64 : i32
    %71 = vector.broadcast %c64_i32_21 : i32 to vector<8x128xi32>
    %72 = arith.cmpi sge, %70, %71 : vector<8x128xi32>
    %c96_i32_22 = arith.constant 96 : i32
    %73 = vector.broadcast %c96_i32_22 : i32 to vector<8x128xi32>
    %74 = arith.cmpi slt, %70, %73 : vector<8x128xi32>
    %75 = arith.andi %72, %74 : vector<8x128xi1>
    %76 = arith.select %75, %69, %68 : vector<8x128xi1>, vector<8x128xf32>
    %77 = vector.extract_strided_slice %76 {offsets = [0, 0], sizes = [8, 32], strides = [1, 1]} : vector<8x128xf32> to vector<8x32xf32>
    %78 = vector.extract_strided_slice %76 {offsets = [0, 32], sizes = [8, 32], strides = [1, 1]} : vector<8x128xf32> to vector<8x32xf32>
    %79 = vector.extract_strided_slice %76 {offsets = [0, 64], sizes = [8, 32], strides = [1, 1]} : vector<8x128xf32> to vector<8x32xf32>
    %80 = vector.extract_strided_slice %76 {offsets = [0, 96], sizes = [8, 32], strides = [1, 1]} : vector<8x128xf32> to vector<8x32xf32>
    %81 = arith.mulf %78, %58 : vector<8x32xf32>
    %82 = arith.mulf %77, %79 : vector<8x32xf32>
    %83 = arith.addf %81, %82 : vector<8x32xf32>
    %84 = math.tanh %83 : vector<8x32xf32>
    %85 = arith.mulf %80, %84 : vector<8x32xf32>
    %86 = vector.extract_strided_slice %6 {offsets = [24, 0], sizes = [8, 128], strides = [1, 1]} : vector<64x128xf32> to vector<8x128xf32>
    %cst_23 = arith.constant dense<0.000000e+00> : vector<8x128xf32>
    %87 = tpu.matmul %85, %2, %cst_23 {dimension_numbers = #tpu.dot_dimension_numbers<[1], [0], [0], [1], [0, 0, 1, 1], [], []>} : vector<8x32xf32>, vector<32x128xf32>, vector<8x128xf32> -> vector<8x128xf32>
    %88 = arith.addf %86, %87 : vector<8x128xf32>
    %89 = arith.negf %88 : vector<8x128xf32>
    %90 = math.exp %89 : vector<8x128xf32>
    %cst_24 = arith.constant 1.000000e+00 : f32
    %91 = vector.broadcast %cst_24 : f32 to vector<8x128xf32>
    %92 = arith.addf %91, %90 : vector<8x128xf32>
    %93 = arith.divf %91, %92 : vector<8x128xf32>
    %94 = math.tanh %88 : vector<8x128xf32>
    %95 = tpu.iota {dimensions = array<i32: 1>} : vector<8x128xi32>
    %c64_i32_25 = arith.constant 64 : i32
    %96 = vector.broadcast %c64_i32_25 : i32 to vector<8x128xi32>
    %97 = arith.cmpi sge, %95, %96 : vector<8x128xi32>
    %c96_i32_26 = arith.constant 96 : i32
    %98 = vector.broadcast %c96_i32_26 : i32 to vector<8x128xi32>
    %99 = arith.cmpi slt, %95, %98 : vector<8x128xi32>
    %100 = arith.andi %97, %99 : vector<8x128xi1>
    %101 = arith.select %100, %94, %93 : vector<8x128xi1>, vector<8x128xf32>
    %102 = vector.extract_strided_slice %101 {offsets = [0, 0], sizes = [8, 32], strides = [1, 1]} : vector<8x128xf32> to vector<8x32xf32>
    %103 = vector.extract_strided_slice %101 {offsets = [0, 32], sizes = [8, 32], strides = [1, 1]} : vector<8x128xf32> to vector<8x32xf32>
    %104 = vector.extract_strided_slice %101 {offsets = [0, 64], sizes = [8, 32], strides = [1, 1]} : vector<8x128xf32> to vector<8x32xf32>
    %105 = vector.extract_strided_slice %101 {offsets = [0, 96], sizes = [8, 32], strides = [1, 1]} : vector<8x128xf32> to vector<8x32xf32>
    %106 = arith.mulf %103, %83 : vector<8x32xf32>
    %107 = arith.mulf %102, %104 : vector<8x32xf32>
    %108 = arith.addf %106, %107 : vector<8x32xf32>
    %109 = math.tanh %108 : vector<8x32xf32>
    %110 = arith.mulf %105, %109 : vector<8x32xf32>
    %111 = vector.extract_strided_slice %6 {offsets = [32, 0], sizes = [8, 128], strides = [1, 1]} : vector<64x128xf32> to vector<8x128xf32>
    %cst_27 = arith.constant dense<0.000000e+00> : vector<8x128xf32>
    %112 = tpu.matmul %110, %2, %cst_27 {dimension_numbers = #tpu.dot_dimension_numbers<[1], [0], [0], [1], [0, 0, 1, 1], [], []>} : vector<8x32xf32>, vector<32x128xf32>, vector<8x128xf32> -> vector<8x128xf32>
    %113 = arith.addf %111, %112 : vector<8x128xf32>
    %114 = arith.negf %113 : vector<8x128xf32>
    %115 = math.exp %114 : vector<8x128xf32>
    %cst_28 = arith.constant 1.000000e+00 : f32
    %116 = vector.broadcast %cst_28 : f32 to vector<8x128xf32>
    %117 = arith.addf %116, %115 : vector<8x128xf32>
    %118 = arith.divf %116, %117 : vector<8x128xf32>
    %119 = math.tanh %113 : vector<8x128xf32>
    %120 = tpu.iota {dimensions = array<i32: 1>} : vector<8x128xi32>
    %c64_i32_29 = arith.constant 64 : i32
    %121 = vector.broadcast %c64_i32_29 : i32 to vector<8x128xi32>
    %122 = arith.cmpi sge, %120, %121 : vector<8x128xi32>
    %c96_i32_30 = arith.constant 96 : i32
    %123 = vector.broadcast %c96_i32_30 : i32 to vector<8x128xi32>
    %124 = arith.cmpi slt, %120, %123 : vector<8x128xi32>
    %125 = arith.andi %122, %124 : vector<8x128xi1>
    %126 = arith.select %125, %119, %118 : vector<8x128xi1>, vector<8x128xf32>
    %127 = vector.extract_strided_slice %126 {offsets = [0, 0], sizes = [8, 32], strides = [1, 1]} : vector<8x128xf32> to vector<8x32xf32>
    %128 = vector.extract_strided_slice %126 {offsets = [0, 32], sizes = [8, 32], strides = [1, 1]} : vector<8x128xf32> to vector<8x32xf32>
    %129 = vector.extract_strided_slice %126 {offsets = [0, 64], sizes = [8, 32], strides = [1, 1]} : vector<8x128xf32> to vector<8x32xf32>
    %130 = vector.extract_strided_slice %126 {offsets = [0, 96], sizes = [8, 32], strides = [1, 1]} : vector<8x128xf32> to vector<8x32xf32>
    %131 = arith.mulf %128, %108 : vector<8x32xf32>
    %132 = arith.mulf %127, %129 : vector<8x32xf32>
    %133 = arith.addf %131, %132 : vector<8x32xf32>
    %134 = math.tanh %133 : vector<8x32xf32>
    %135 = arith.mulf %130, %134 : vector<8x32xf32>
    %136 = vector.extract_strided_slice %6 {offsets = [40, 0], sizes = [8, 128], strides = [1, 1]} : vector<64x128xf32> to vector<8x128xf32>
    %cst_31 = arith.constant dense<0.000000e+00> : vector<8x128xf32>
    %137 = tpu.matmul %135, %2, %cst_31 {dimension_numbers = #tpu.dot_dimension_numbers<[1], [0], [0], [1], [0, 0, 1, 1], [], []>} : vector<8x32xf32>, vector<32x128xf32>, vector<8x128xf32> -> vector<8x128xf32>
    %138 = arith.addf %136, %137 : vector<8x128xf32>
    %139 = arith.negf %138 : vector<8x128xf32>
    %140 = math.exp %139 : vector<8x128xf32>
    %cst_32 = arith.constant 1.000000e+00 : f32
    %141 = vector.broadcast %cst_32 : f32 to vector<8x128xf32>
    %142 = arith.addf %141, %140 : vector<8x128xf32>
    %143 = arith.divf %141, %142 : vector<8x128xf32>
    %144 = math.tanh %138 : vector<8x128xf32>
    %145 = tpu.iota {dimensions = array<i32: 1>} : vector<8x128xi32>
    %c64_i32_33 = arith.constant 64 : i32
    %146 = vector.broadcast %c64_i32_33 : i32 to vector<8x128xi32>
    %147 = arith.cmpi sge, %145, %146 : vector<8x128xi32>
    %c96_i32_34 = arith.constant 96 : i32
    %148 = vector.broadcast %c96_i32_34 : i32 to vector<8x128xi32>
    %149 = arith.cmpi slt, %145, %148 : vector<8x128xi32>
    %150 = arith.andi %147, %149 : vector<8x128xi1>
    %151 = arith.select %150, %144, %143 : vector<8x128xi1>, vector<8x128xf32>
    %152 = vector.extract_strided_slice %151 {offsets = [0, 0], sizes = [8, 32], strides = [1, 1]} : vector<8x128xf32> to vector<8x32xf32>
    %153 = vector.extract_strided_slice %151 {offsets = [0, 32], sizes = [8, 32], strides = [1, 1]} : vector<8x128xf32> to vector<8x32xf32>
    %154 = vector.extract_strided_slice %151 {offsets = [0, 64], sizes = [8, 32], strides = [1, 1]} : vector<8x128xf32> to vector<8x32xf32>
    %155 = vector.extract_strided_slice %151 {offsets = [0, 96], sizes = [8, 32], strides = [1, 1]} : vector<8x128xf32> to vector<8x32xf32>
    %156 = arith.mulf %153, %133 : vector<8x32xf32>
    %157 = arith.mulf %152, %154 : vector<8x32xf32>
    %158 = arith.addf %156, %157 : vector<8x32xf32>
    %159 = math.tanh %158 : vector<8x32xf32>
    %160 = arith.mulf %155, %159 : vector<8x32xf32>
    %161 = vector.extract_strided_slice %6 {offsets = [48, 0], sizes = [8, 128], strides = [1, 1]} : vector<64x128xf32> to vector<8x128xf32>
    %cst_35 = arith.constant dense<0.000000e+00> : vector<8x128xf32>
    %162 = tpu.matmul %160, %2, %cst_35 {dimension_numbers = #tpu.dot_dimension_numbers<[1], [0], [0], [1], [0, 0, 1, 1], [], []>} : vector<8x32xf32>, vector<32x128xf32>, vector<8x128xf32> -> vector<8x128xf32>
    %163 = arith.addf %161, %162 : vector<8x128xf32>
    %164 = arith.negf %163 : vector<8x128xf32>
    %165 = math.exp %164 : vector<8x128xf32>
    %cst_36 = arith.constant 1.000000e+00 : f32
    %166 = vector.broadcast %cst_36 : f32 to vector<8x128xf32>
    %167 = arith.addf %166, %165 : vector<8x128xf32>
    %168 = arith.divf %166, %167 : vector<8x128xf32>
    %169 = math.tanh %163 : vector<8x128xf32>
    %170 = tpu.iota {dimensions = array<i32: 1>} : vector<8x128xi32>
    %c64_i32_37 = arith.constant 64 : i32
    %171 = vector.broadcast %c64_i32_37 : i32 to vector<8x128xi32>
    %172 = arith.cmpi sge, %170, %171 : vector<8x128xi32>
    %c96_i32_38 = arith.constant 96 : i32
    %173 = vector.broadcast %c96_i32_38 : i32 to vector<8x128xi32>
    %174 = arith.cmpi slt, %170, %173 : vector<8x128xi32>
    %175 = arith.andi %172, %174 : vector<8x128xi1>
    %176 = arith.select %175, %169, %168 : vector<8x128xi1>, vector<8x128xf32>
    %177 = vector.extract_strided_slice %176 {offsets = [0, 0], sizes = [8, 32], strides = [1, 1]} : vector<8x128xf32> to vector<8x32xf32>
    %178 = vector.extract_strided_slice %176 {offsets = [0, 32], sizes = [8, 32], strides = [1, 1]} : vector<8x128xf32> to vector<8x32xf32>
    %179 = vector.extract_strided_slice %176 {offsets = [0, 64], sizes = [8, 32], strides = [1, 1]} : vector<8x128xf32> to vector<8x32xf32>
    %180 = vector.extract_strided_slice %176 {offsets = [0, 96], sizes = [8, 32], strides = [1, 1]} : vector<8x128xf32> to vector<8x32xf32>
    %181 = arith.mulf %178, %158 : vector<8x32xf32>
    %182 = arith.mulf %177, %179 : vector<8x32xf32>
    %183 = arith.addf %181, %182 : vector<8x32xf32>
    %184 = math.tanh %183 : vector<8x32xf32>
    %185 = arith.mulf %180, %184 : vector<8x32xf32>
    %186 = vector.extract_strided_slice %6 {offsets = [56, 0], sizes = [8, 128], strides = [1, 1]} : vector<64x128xf32> to vector<8x128xf32>
    %cst_39 = arith.constant dense<0.000000e+00> : vector<8x128xf32>
    %187 = tpu.matmul %185, %2, %cst_39 {dimension_numbers = #tpu.dot_dimension_numbers<[1], [0], [0], [1], [0, 0, 1, 1], [], []>} : vector<8x32xf32>, vector<32x128xf32>, vector<8x128xf32> -> vector<8x128xf32>
    %188 = arith.addf %186, %187 : vector<8x128xf32>
    %189 = arith.negf %188 : vector<8x128xf32>
    %190 = math.exp %189 : vector<8x128xf32>
    %cst_40 = arith.constant 1.000000e+00 : f32
    %191 = vector.broadcast %cst_40 : f32 to vector<8x128xf32>
    %192 = arith.addf %191, %190 : vector<8x128xf32>
    %193 = arith.divf %191, %192 : vector<8x128xf32>
    %194 = math.tanh %188 : vector<8x128xf32>
    %195 = tpu.iota {dimensions = array<i32: 1>} : vector<8x128xi32>
    %c64_i32_41 = arith.constant 64 : i32
    %196 = vector.broadcast %c64_i32_41 : i32 to vector<8x128xi32>
    %197 = arith.cmpi sge, %195, %196 : vector<8x128xi32>
    %c96_i32_42 = arith.constant 96 : i32
    %198 = vector.broadcast %c96_i32_42 : i32 to vector<8x128xi32>
    %199 = arith.cmpi slt, %195, %198 : vector<8x128xi32>
    %200 = arith.andi %197, %199 : vector<8x128xi1>
    %201 = arith.select %200, %194, %193 : vector<8x128xi1>, vector<8x128xf32>
    %202 = vector.extract_strided_slice %201 {offsets = [0, 0], sizes = [8, 32], strides = [1, 1]} : vector<8x128xf32> to vector<8x32xf32>
    %203 = vector.extract_strided_slice %201 {offsets = [0, 32], sizes = [8, 32], strides = [1, 1]} : vector<8x128xf32> to vector<8x32xf32>
    %204 = vector.extract_strided_slice %201 {offsets = [0, 64], sizes = [8, 32], strides = [1, 1]} : vector<8x128xf32> to vector<8x32xf32>
    %205 = vector.extract_strided_slice %201 {offsets = [0, 96], sizes = [8, 32], strides = [1, 1]} : vector<8x128xf32> to vector<8x32xf32>
    %206 = arith.mulf %203, %183 : vector<8x32xf32>
    %207 = arith.mulf %202, %204 : vector<8x32xf32>
    %208 = arith.addf %206, %207 : vector<8x32xf32>
    %209 = math.tanh %208 : vector<8x32xf32>
    %210 = arith.mulf %205, %209 : vector<8x32xf32>
    %c0_43 = arith.constant 0 : index
    %c0_44 = arith.constant 0 : index
    %c0_45 = arith.constant 0 : index
    %211 = vector.load %arg12[%c0_43, %c0_44, %c0_45] : memref<2x8x32xf32, #tpu.memory_space<vmem>>, vector<1x8x32xf32>
    %212 = vector.shape_cast %211 : vector<1x8x32xf32> to vector<8x32xf32>
    %213 = vector.shape_cast %210 : vector<8x32xf32> to vector<1x8x32xf32>
    tpu.vector_store %arg12[%c0_43, %c0_44, %c0_45], %213 {strides = array<i32>} : memref<2x8x32xf32, #tpu.memory_space<vmem>>, vector<1x8x32xf32>,
    %c0_46 = arith.constant 0 : index
    %c0_47 = arith.constant 0 : index
    %c0_48 = arith.constant 0 : index
    %214 = vector.load %arg13[%c0_46, %c0_47, %c0_48] : memref<2x8x32xf32, #tpu.memory_space<vmem>>, vector<1x8x32xf32>
    %215 = vector.shape_cast %214 : vector<1x8x32xf32> to vector<8x32xf32>
    %216 = vector.shape_cast %208 : vector<8x32xf32> to vector<1x8x32xf32>
    tpu.vector_store %arg13[%c0_46, %c0_47, %c0_48], %216 {strides = array<i32>} : memref<2x8x32xf32, #tpu.memory_space<vmem>>, vector<1x8x32xf32>,
    %217 = tpu.concatenate %35, %60, %85, %110, %135, %160, %185, %210 in 0 : vector<8x32xf32>, vector<8x32xf32>, vector<8x32xf32>, vector<8x32xf32>, vector<8x32xf32>, vector<8x32xf32>, vector<8x32xf32>, vector<8x32xf32> -> vector<64x32xf32>
    %c0_49 = arith.constant 0 : index
    %c0_50 = arith.constant 0 : index
    %218 = vector.load %arg6[%c0_49, %c0_50] : memref<32x128xf32, #tpu.memory_space<vmem>>, vector<32x128xf32>
    %c0_51 = arith.constant 0 : index
    %c0_52 = arith.constant 0 : index
    %219 = vector.load %arg7[%c0_51, %c0_52] : memref<32x128xf32, #tpu.memory_space<vmem>>, vector<32x128xf32>
    %c0_53 = arith.constant 0 : index
    %c0_54 = arith.constant 0 : index
    %220 = vector.load %arg8[%c0_53, %c0_54] : memref<1x128xf32, #tpu.memory_space<vmem>>, vector<1x128xf32>
    %cst_55 = arith.constant dense<0.000000e+00> : vector<64x128xf32>
    %221 = tpu.matmul %217, %218, %cst_55 {dimension_numbers = #tpu.dot_dimension_numbers<[1], [0], [0], [1], [0, 0, 1, 1], [], []>} : vector<64x32xf32>, vector<32x128xf32>, vector<64x128xf32> -> vector<64x128xf32>
    %222 = vector.broadcast %220 : vector<1x128xf32> to vector<64x128xf32>
    %223 = arith.addf %221, %222 : vector<64x128xf32>
    %c1 = arith.constant 1 : index
    %c0_56 = arith.constant 0 : index
    %c0_57 = arith.constant 0 : index
    %224 = vector.load %arg1[%c1, %c0_56, %c0_57] : memref<2x8x32xf32, #tpu.memory_space<vmem>>, vector<1x8x32xf32>
    %225 = vector.shape_cast %224 : vector<1x8x32xf32> to vector<8x32xf32>
    %c1_58 = arith.constant 1 : index
    %c0_59 = arith.constant 0 : index
    %c0_60 = arith.constant 0 : index
    %226 = vector.load %arg2[%c1_58, %c0_59, %c0_60] : memref<2x8x32xf32, #tpu.memory_space<vmem>>, vector<1x8x32xf32>
    %227 = vector.shape_cast %226 : vector<1x8x32xf32> to vector<8x32xf32>
    %228 = vector.extract_strided_slice %223 {offsets = [0, 0], sizes = [8, 128], strides = [1, 1]} : vector<64x128xf32> to vector<8x128xf32>
    %cst_61 = arith.constant dense<0.000000e+00> : vector<8x128xf32>
    %229 = tpu.matmul %225, %219, %cst_61 {dimension_numbers = #tpu.dot_dimension_numbers<[1], [0], [0], [1], [0, 0, 1, 1], [], []>} : vector<8x32xf32>, vector<32x128xf32>, vector<8x128xf32> -> vector<8x128xf32>
    %230 = arith.addf %228, %229 : vector<8x128xf32>
    %231 = arith.negf %230 : vector<8x128xf32>
    %232 = math.exp %231 : vector<8x128xf32>
    %cst_62 = arith.constant 1.000000e+00 : f32
    %233 = vector.broadcast %cst_62 : f32 to vector<8x128xf32>
    %234 = arith.addf %233, %232 : vector<8x128xf32>
    %235 = arith.divf %233, %234 : vector<8x128xf32>
    %236 = math.tanh %230 : vector<8x128xf32>
    %237 = tpu.iota {dimensions = array<i32: 1>} : vector<8x128xi32>
    %c64_i32_63 = arith.constant 64 : i32
    %238 = vector.broadcast %c64_i32_63 : i32 to vector<8x128xi32>
    %239 = arith.cmpi sge, %237, %238 : vector<8x128xi32>
    %c96_i32_64 = arith.constant 96 : i32
    %240 = vector.broadcast %c96_i32_64 : i32 to vector<8x128xi32>
    %241 = arith.cmpi slt, %237, %240 : vector<8x128xi32>
    %242 = arith.andi %239, %241 : vector<8x128xi1>
    %243 = arith.select %242, %236, %235 : vector<8x128xi1>, vector<8x128xf32>
    %244 = vector.extract_strided_slice %243 {offsets = [0, 0], sizes = [8, 32], strides = [1, 1]} : vector<8x128xf32> to vector<8x32xf32>
    %245 = vector.extract_strided_slice %243 {offsets = [0, 32], sizes = [8, 32], strides = [1, 1]} : vector<8x128xf32> to vector<8x32xf32>
    %246 = vector.extract_strided_slice %243 {offsets = [0, 64], sizes = [8, 32], strides = [1, 1]} : vector<8x128xf32> to vector<8x32xf32>
    %247 = vector.extract_strided_slice %243 {offsets = [0, 96], sizes = [8, 32], strides = [1, 1]} : vector<8x128xf32> to vector<8x32xf32>
    %248 = arith.mulf %245, %227 : vector<8x32xf32>
    %249 = arith.mulf %244, %246 : vector<8x32xf32>
    %250 = arith.addf %248, %249 : vector<8x32xf32>
    %251 = math.tanh %250 : vector<8x32xf32>
    %252 = arith.mulf %247, %251 : vector<8x32xf32>
    %253 = vector.extract_strided_slice %223 {offsets = [8, 0], sizes = [8, 128], strides = [1, 1]} : vector<64x128xf32> to vector<8x128xf32>
    %cst_65 = arith.constant dense<0.000000e+00> : vector<8x128xf32>
    %254 = tpu.matmul %252, %219, %cst_65 {dimension_numbers = #tpu.dot_dimension_numbers<[1], [0], [0], [1], [0, 0, 1, 1], [], []>} : vector<8x32xf32>, vector<32x128xf32>, vector<8x128xf32> -> vector<8x128xf32>
    %255 = arith.addf %253, %254 : vector<8x128xf32>
    %256 = arith.negf %255 : vector<8x128xf32>
    %257 = math.exp %256 : vector<8x128xf32>
    %cst_66 = arith.constant 1.000000e+00 : f32
    %258 = vector.broadcast %cst_66 : f32 to vector<8x128xf32>
    %259 = arith.addf %258, %257 : vector<8x128xf32>
    %260 = arith.divf %258, %259 : vector<8x128xf32>
    %261 = math.tanh %255 : vector<8x128xf32>
    %262 = tpu.iota {dimensions = array<i32: 1>} : vector<8x128xi32>
    %c64_i32_67 = arith.constant 64 : i32
    %263 = vector.broadcast %c64_i32_67 : i32 to vector<8x128xi32>
    %264 = arith.cmpi sge, %262, %263 : vector<8x128xi32>
    %c96_i32_68 = arith.constant 96 : i32
    %265 = vector.broadcast %c96_i32_68 : i32 to vector<8x128xi32>
    %266 = arith.cmpi slt, %262, %265 : vector<8x128xi32>
    %267 = arith.andi %264, %266 : vector<8x128xi1>
    %268 = arith.select %267, %261, %260 : vector<8x128xi1>, vector<8x128xf32>
    %269 = vector.extract_strided_slice %268 {offsets = [0, 0], sizes = [8, 32], strides = [1, 1]} : vector<8x128xf32> to vector<8x32xf32>
    %270 = vector.extract_strided_slice %268 {offsets = [0, 32], sizes = [8, 32], strides = [1, 1]} : vector<8x128xf32> to vector<8x32xf32>
    %271 = vector.extract_strided_slice %268 {offsets = [0, 64], sizes = [8, 32], strides = [1, 1]} : vector<8x128xf32> to vector<8x32xf32>
    %272 = vector.extract_strided_slice %268 {offsets = [0, 96], sizes = [8, 32], strides = [1, 1]} : vector<8x128xf32> to vector<8x32xf32>
    %273 = arith.mulf %270, %250 : vector<8x32xf32>
    %274 = arith.mulf %269, %271 : vector<8x32xf32>
    %275 = arith.addf %273, %274 : vector<8x32xf32>
    %276 = math.tanh %275 : vector<8x32xf32>
    %277 = arith.mulf %272, %276 : vector<8x32xf32>
    %278 = vector.extract_strided_slice %223 {offsets = [16, 0], sizes = [8, 128], strides = [1, 1]} : vector<64x128xf32> to vector<8x128xf32>
    %cst_69 = arith.constant dense<0.000000e+00> : vector<8x128xf32>
    %279 = tpu.matmul %277, %219, %cst_69 {dimension_numbers = #tpu.dot_dimension_numbers<[1], [0], [0], [1], [0, 0, 1, 1], [], []>} : vector<8x32xf32>, vector<32x128xf32>, vector<8x128xf32> -> vector<8x128xf32>
    %280 = arith.addf %278, %279 : vector<8x128xf32>
    %281 = arith.negf %280 : vector<8x128xf32>
    %282 = math.exp %281 : vector<8x128xf32>
    %cst_70 = arith.constant 1.000000e+00 : f32
    %283 = vector.broadcast %cst_70 : f32 to vector<8x128xf32>
    %284 = arith.addf %283, %282 : vector<8x128xf32>
    %285 = arith.divf %283, %284 : vector<8x128xf32>
    %286 = math.tanh %280 : vector<8x128xf32>
    %287 = tpu.iota {dimensions = array<i32: 1>} : vector<8x128xi32>
    %c64_i32_71 = arith.constant 64 : i32
    %288 = vector.broadcast %c64_i32_71 : i32 to vector<8x128xi32>
    %289 = arith.cmpi sge, %287, %288 : vector<8x128xi32>
    %c96_i32_72 = arith.constant 96 : i32
    %290 = vector.broadcast %c96_i32_72 : i32 to vector<8x128xi32>
    %291 = arith.cmpi slt, %287, %290 : vector<8x128xi32>
    %292 = arith.andi %289, %291 : vector<8x128xi1>
    %293 = arith.select %292, %286, %285 : vector<8x128xi1>, vector<8x128xf32>
    %294 = vector.extract_strided_slice %293 {offsets = [0, 0], sizes = [8, 32], strides = [1, 1]} : vector<8x128xf32> to vector<8x32xf32>
    %295 = vector.extract_strided_slice %293 {offsets = [0, 32], sizes = [8, 32], strides = [1, 1]} : vector<8x128xf32> to vector<8x32xf32>
    %296 = vector.extract_strided_slice %293 {offsets = [0, 64], sizes = [8, 32], strides = [1, 1]} : vector<8x128xf32> to vector<8x32xf32>
    %297 = vector.extract_strided_slice %293 {offsets = [0, 96], sizes = [8, 32], strides = [1, 1]} : vector<8x128xf32> to vector<8x32xf32>
    %298 = arith.mulf %295, %275 : vector<8x32xf32>
    %299 = arith.mulf %294, %296 : vector<8x32xf32>
    %300 = arith.addf %298, %299 : vector<8x32xf32>
    %301 = math.tanh %300 : vector<8x32xf32>
    %302 = arith.mulf %297, %301 : vector<8x32xf32>
    %303 = vector.extract_strided_slice %223 {offsets = [24, 0], sizes = [8, 128], strides = [1, 1]} : vector<64x128xf32> to vector<8x128xf32>
    %cst_73 = arith.constant dense<0.000000e+00> : vector<8x128xf32>
    %304 = tpu.matmul %302, %219, %cst_73 {dimension_numbers = #tpu.dot_dimension_numbers<[1], [0], [0], [1], [0, 0, 1, 1], [], []>} : vector<8x32xf32>, vector<32x128xf32>, vector<8x128xf32> -> vector<8x128xf32>
    %305 = arith.addf %303, %304 : vector<8x128xf32>
    %306 = arith.negf %305 : vector<8x128xf32>
    %307 = math.exp %306 : vector<8x128xf32>
    %cst_74 = arith.constant 1.000000e+00 : f32
    %308 = vector.broadcast %cst_74 : f32 to vector<8x128xf32>
    %309 = arith.addf %308, %307 : vector<8x128xf32>
    %310 = arith.divf %308, %309 : vector<8x128xf32>
    %311 = math.tanh %305 : vector<8x128xf32>
    %312 = tpu.iota {dimensions = array<i32: 1>} : vector<8x128xi32>
    %c64_i32_75 = arith.constant 64 : i32
    %313 = vector.broadcast %c64_i32_75 : i32 to vector<8x128xi32>
    %314 = arith.cmpi sge, %312, %313 : vector<8x128xi32>
    %c96_i32_76 = arith.constant 96 : i32
    %315 = vector.broadcast %c96_i32_76 : i32 to vector<8x128xi32>
    %316 = arith.cmpi slt, %312, %315 : vector<8x128xi32>
    %317 = arith.andi %314, %316 : vector<8x128xi1>
    %318 = arith.select %317, %311, %310 : vector<8x128xi1>, vector<8x128xf32>
    %319 = vector.extract_strided_slice %318 {offsets = [0, 0], sizes = [8, 32], strides = [1, 1]} : vector<8x128xf32> to vector<8x32xf32>
    %320 = vector.extract_strided_slice %318 {offsets = [0, 32], sizes = [8, 32], strides = [1, 1]} : vector<8x128xf32> to vector<8x32xf32>
    %321 = vector.extract_strided_slice %318 {offsets = [0, 64], sizes = [8, 32], strides = [1, 1]} : vector<8x128xf32> to vector<8x32xf32>
    %322 = vector.extract_strided_slice %318 {offsets = [0, 96], sizes = [8, 32], strides = [1, 1]} : vector<8x128xf32> to vector<8x32xf32>
    %323 = arith.mulf %320, %300 : vector<8x32xf32>
    %324 = arith.mulf %319, %321 : vector<8x32xf32>
    %325 = arith.addf %323, %324 : vector<8x32xf32>
    %326 = math.tanh %325 : vector<8x32xf32>
    %327 = arith.mulf %322, %326 : vector<8x32xf32>
    %328 = vector.extract_strided_slice %223 {offsets = [32, 0], sizes = [8, 128], strides = [1, 1]} : vector<64x128xf32> to vector<8x128xf32>
    %cst_77 = arith.constant dense<0.000000e+00> : vector<8x128xf32>
    %329 = tpu.matmul %327, %219, %cst_77 {dimension_numbers = #tpu.dot_dimension_numbers<[1], [0], [0], [1], [0, 0, 1, 1], [], []>} : vector<8x32xf32>, vector<32x128xf32>, vector<8x128xf32> -> vector<8x128xf32>
    %330 = arith.addf %328, %329 : vector<8x128xf32>
    %331 = arith.negf %330 : vector<8x128xf32>
    %332 = math.exp %331 : vector<8x128xf32>
    %cst_78 = arith.constant 1.000000e+00 : f32
    %333 = vector.broadcast %cst_78 : f32 to vector<8x128xf32>
    %334 = arith.addf %333, %332 : vector<8x128xf32>
    %335 = arith.divf %333, %334 : vector<8x128xf32>
    %336 = math.tanh %330 : vector<8x128xf32>
    %337 = tpu.iota {dimensions = array<i32: 1>} : vector<8x128xi32>
    %c64_i32_79 = arith.constant 64 : i32
    %338 = vector.broadcast %c64_i32_79 : i32 to vector<8x128xi32>
    %339 = arith.cmpi sge, %337, %338 : vector<8x128xi32>
    %c96_i32_80 = arith.constant 96 : i32
    %340 = vector.broadcast %c96_i32_80 : i32 to vector<8x128xi32>
    %341 = arith.cmpi slt, %337, %340 : vector<8x128xi32>
    %342 = arith.andi %339, %341 : vector<8x128xi1>
    %343 = arith.select %342, %336, %335 : vector<8x128xi1>, vector<8x128xf32>
    %344 = vector.extract_strided_slice %343 {offsets = [0, 0], sizes = [8, 32], strides = [1, 1]} : vector<8x128xf32> to vector<8x32xf32>
    %345 = vector.extract_strided_slice %343 {offsets = [0, 32], sizes = [8, 32], strides = [1, 1]} : vector<8x128xf32> to vector<8x32xf32>
    %346 = vector.extract_strided_slice %343 {offsets = [0, 64], sizes = [8, 32], strides = [1, 1]} : vector<8x128xf32> to vector<8x32xf32>
    %347 = vector.extract_strided_slice %343 {offsets = [0, 96], sizes = [8, 32], strides = [1, 1]} : vector<8x128xf32> to vector<8x32xf32>
    %348 = arith.mulf %345, %325 : vector<8x32xf32>
    %349 = arith.mulf %344, %346 : vector<8x32xf32>
    %350 = arith.addf %348, %349 : vector<8x32xf32>
    %351 = math.tanh %350 : vector<8x32xf32>
    %352 = arith.mulf %347, %351 : vector<8x32xf32>
    %353 = vector.extract_strided_slice %223 {offsets = [40, 0], sizes = [8, 128], strides = [1, 1]} : vector<64x128xf32> to vector<8x128xf32>
    %cst_81 = arith.constant dense<0.000000e+00> : vector<8x128xf32>
    %354 = tpu.matmul %352, %219, %cst_81 {dimension_numbers = #tpu.dot_dimension_numbers<[1], [0], [0], [1], [0, 0, 1, 1], [], []>} : vector<8x32xf32>, vector<32x128xf32>, vector<8x128xf32> -> vector<8x128xf32>
    %355 = arith.addf %353, %354 : vector<8x128xf32>
    %356 = arith.negf %355 : vector<8x128xf32>
    %357 = math.exp %356 : vector<8x128xf32>
    %cst_82 = arith.constant 1.000000e+00 : f32
    %358 = vector.broadcast %cst_82 : f32 to vector<8x128xf32>
    %359 = arith.addf %358, %357 : vector<8x128xf32>
    %360 = arith.divf %358, %359 : vector<8x128xf32>
    %361 = math.tanh %355 : vector<8x128xf32>
    %362 = tpu.iota {dimensions = array<i32: 1>} : vector<8x128xi32>
    %c64_i32_83 = arith.constant 64 : i32
    %363 = vector.broadcast %c64_i32_83 : i32 to vector<8x128xi32>
    %364 = arith.cmpi sge, %362, %363 : vector<8x128xi32>
    %c96_i32_84 = arith.constant 96 : i32
    %365 = vector.broadcast %c96_i32_84 : i32 to vector<8x128xi32>
    %366 = arith.cmpi slt, %362, %365 : vector<8x128xi32>
    %367 = arith.andi %364, %366 : vector<8x128xi1>
    %368 = arith.select %367, %361, %360 : vector<8x128xi1>, vector<8x128xf32>
    %369 = vector.extract_strided_slice %368 {offsets = [0, 0], sizes = [8, 32], strides = [1, 1]} : vector<8x128xf32> to vector<8x32xf32>
    %370 = vector.extract_strided_slice %368 {offsets = [0, 32], sizes = [8, 32], strides = [1, 1]} : vector<8x128xf32> to vector<8x32xf32>
    %371 = vector.extract_strided_slice %368 {offsets = [0, 64], sizes = [8, 32], strides = [1, 1]} : vector<8x128xf32> to vector<8x32xf32>
    %372 = vector.extract_strided_slice %368 {offsets = [0, 96], sizes = [8, 32], strides = [1, 1]} : vector<8x128xf32> to vector<8x32xf32>
    %373 = arith.mulf %370, %350 : vector<8x32xf32>
    %374 = arith.mulf %369, %371 : vector<8x32xf32>
    %375 = arith.addf %373, %374 : vector<8x32xf32>
    %376 = math.tanh %375 : vector<8x32xf32>
    %377 = arith.mulf %372, %376 : vector<8x32xf32>
    %378 = vector.extract_strided_slice %223 {offsets = [48, 0], sizes = [8, 128], strides = [1, 1]} : vector<64x128xf32> to vector<8x128xf32>
    %cst_85 = arith.constant dense<0.000000e+00> : vector<8x128xf32>
    %379 = tpu.matmul %377, %219, %cst_85 {dimension_numbers = #tpu.dot_dimension_numbers<[1], [0], [0], [1], [0, 0, 1, 1], [], []>} : vector<8x32xf32>, vector<32x128xf32>, vector<8x128xf32> -> vector<8x128xf32>
    %380 = arith.addf %378, %379 : vector<8x128xf32>
    %381 = arith.negf %380 : vector<8x128xf32>
    %382 = math.exp %381 : vector<8x128xf32>
    %cst_86 = arith.constant 1.000000e+00 : f32
    %383 = vector.broadcast %cst_86 : f32 to vector<8x128xf32>
    %384 = arith.addf %383, %382 : vector<8x128xf32>
    %385 = arith.divf %383, %384 : vector<8x128xf32>
    %386 = math.tanh %380 : vector<8x128xf32>
    %387 = tpu.iota {dimensions = array<i32: 1>} : vector<8x128xi32>
    %c64_i32_87 = arith.constant 64 : i32
    %388 = vector.broadcast %c64_i32_87 : i32 to vector<8x128xi32>
    %389 = arith.cmpi sge, %387, %388 : vector<8x128xi32>
    %c96_i32_88 = arith.constant 96 : i32
    %390 = vector.broadcast %c96_i32_88 : i32 to vector<8x128xi32>
    %391 = arith.cmpi slt, %387, %390 : vector<8x128xi32>
    %392 = arith.andi %389, %391 : vector<8x128xi1>
    %393 = arith.select %392, %386, %385 : vector<8x128xi1>, vector<8x128xf32>
    %394 = vector.extract_strided_slice %393 {offsets = [0, 0], sizes = [8, 32], strides = [1, 1]} : vector<8x128xf32> to vector<8x32xf32>
    %395 = vector.extract_strided_slice %393 {offsets = [0, 32], sizes = [8, 32], strides = [1, 1]} : vector<8x128xf32> to vector<8x32xf32>
    %396 = vector.extract_strided_slice %393 {offsets = [0, 64], sizes = [8, 32], strides = [1, 1]} : vector<8x128xf32> to vector<8x32xf32>
    %397 = vector.extract_strided_slice %393 {offsets = [0, 96], sizes = [8, 32], strides = [1, 1]} : vector<8x128xf32> to vector<8x32xf32>
    %398 = arith.mulf %395, %375 : vector<8x32xf32>
    %399 = arith.mulf %394, %396 : vector<8x32xf32>
    %400 = arith.addf %398, %399 : vector<8x32xf32>
    %401 = math.tanh %400 : vector<8x32xf32>
    %402 = arith.mulf %397, %401 : vector<8x32xf32>
    %403 = vector.extract_strided_slice %223 {offsets = [56, 0], sizes = [8, 128], strides = [1, 1]} : vector<64x128xf32> to vector<8x128xf32>
    %cst_89 = arith.constant dense<0.000000e+00> : vector<8x128xf32>
    %404 = tpu.matmul %402, %219, %cst_89 {dimension_numbers = #tpu.dot_dimension_numbers<[1], [0], [0], [1], [0, 0, 1, 1], [], []>} : vector<8x32xf32>, vector<32x128xf32>, vector<8x128xf32> -> vector<8x128xf32>
    %405 = arith.addf %403, %404 : vector<8x128xf32>
    %406 = arith.negf %405 : vector<8x128xf32>
    %407 = math.exp %406 : vector<8x128xf32>
    %cst_90 = arith.constant 1.000000e+00 : f32
    %408 = vector.broadcast %cst_90 : f32 to vector<8x128xf32>
    %409 = arith.addf %408, %407 : vector<8x128xf32>
    %410 = arith.divf %408, %409 : vector<8x128xf32>
    %411 = math.tanh %405 : vector<8x128xf32>
    %412 = tpu.iota {dimensions = array<i32: 1>} : vector<8x128xi32>
    %c64_i32_91 = arith.constant 64 : i32
    %413 = vector.broadcast %c64_i32_91 : i32 to vector<8x128xi32>
    %414 = arith.cmpi sge, %412, %413 : vector<8x128xi32>
    %c96_i32_92 = arith.constant 96 : i32
    %415 = vector.broadcast %c96_i32_92 : i32 to vector<8x128xi32>
    %416 = arith.cmpi slt, %412, %415 : vector<8x128xi32>
    %417 = arith.andi %414, %416 : vector<8x128xi1>
    %418 = arith.select %417, %411, %410 : vector<8x128xi1>, vector<8x128xf32>
    %419 = vector.extract_strided_slice %418 {offsets = [0, 0], sizes = [8, 32], strides = [1, 1]} : vector<8x128xf32> to vector<8x32xf32>
    %420 = vector.extract_strided_slice %418 {offsets = [0, 32], sizes = [8, 32], strides = [1, 1]} : vector<8x128xf32> to vector<8x32xf32>
    %421 = vector.extract_strided_slice %418 {offsets = [0, 64], sizes = [8, 32], strides = [1, 1]} : vector<8x128xf32> to vector<8x32xf32>
    %422 = vector.extract_strided_slice %418 {offsets = [0, 96], sizes = [8, 32], strides = [1, 1]} : vector<8x128xf32> to vector<8x32xf32>
    %423 = arith.mulf %420, %400 : vector<8x32xf32>
    %424 = arith.mulf %419, %421 : vector<8x32xf32>
    %425 = arith.addf %423, %424 : vector<8x32xf32>
    %426 = math.tanh %425 : vector<8x32xf32>
    %427 = arith.mulf %422, %426 : vector<8x32xf32>
    %c1_93 = arith.constant 1 : index
    %c0_94 = arith.constant 0 : index
    %c0_95 = arith.constant 0 : index
    %428 = vector.load %arg12[%c1_93, %c0_94, %c0_95] : memref<2x8x32xf32, #tpu.memory_space<vmem>>, vector<1x8x32xf32>
    %429 = vector.shape_cast %428 : vector<1x8x32xf32> to vector<8x32xf32>
    %430 = vector.shape_cast %427 : vector<8x32xf32> to vector<1x8x32xf32>
    tpu.vector_store %arg12[%c1_93, %c0_94, %c0_95], %430 {strides = array<i32>} : memref<2x8x32xf32, #tpu.memory_space<vmem>>, vector<1x8x32xf32>,
    %c1_96 = arith.constant 1 : index
    %c0_97 = arith.constant 0 : index
    %c0_98 = arith.constant 0 : index
    %431 = vector.load %arg13[%c1_96, %c0_97, %c0_98] : memref<2x8x32xf32, #tpu.memory_space<vmem>>, vector<1x8x32xf32>
    %432 = vector.shape_cast %431 : vector<1x8x32xf32> to vector<8x32xf32>
    %433 = vector.shape_cast %425 : vector<8x32xf32> to vector<1x8x32xf32>
    tpu.vector_store %arg13[%c1_96, %c0_97, %c0_98], %433 {strides = array<i32>} : memref<2x8x32xf32, #tpu.memory_space<vmem>>, vector<1x8x32xf32>,
    %434 = tpu.concatenate %252, %277, %302, %327, %352, %377, %402, %427 in 0 : vector<8x32xf32>, vector<8x32xf32>, vector<8x32xf32>, vector<8x32xf32>, vector<8x32xf32>, vector<8x32xf32>, vector<8x32xf32>, vector<8x32xf32> -> vector<64x32xf32>
    %c0_99 = arith.constant 0 : index
    %c0_100 = arith.constant 0 : index
    %435 = vector.load %arg9[%c0_99, %c0_100] : memref<32x128xf32, #tpu.memory_space<vmem>>, vector<32x128xf32>
    %c0_101 = arith.constant 0 : index
    %c0_102 = arith.constant 0 : index
    %436 = vector.load %arg10[%c0_101, %c0_102] : memref<1x128xf32, #tpu.memory_space<vmem>>, vector<1x128xf32>
    %cst_103 = arith.constant dense<0.000000e+00> : vector<64x128xf32>
    %437 = tpu.matmul %434, %435, %cst_103 {dimension_numbers = #tpu.dot_dimension_numbers<[1], [0], [0], [1], [0, 0, 1, 1], [], []>} : vector<64x32xf32>, vector<32x128xf32>, vector<64x128xf32> -> vector<64x128xf32>
    %438 = vector.broadcast %436 : vector<1x128xf32> to vector<64x128xf32>
    %439 = arith.addf %437, %438 : vector<64x128xf32>
    %c0_104 = arith.constant 0 : index
    %c0_105 = arith.constant 0 : index
    %440 = vector.load %arg11[%c0_104, %c0_105] : memref<64x128xf32, #tpu.memory_space<vmem>>, vector<64x128xf32>
    tpu.vector_store %arg11[%c0_104, %c0_105], %439 {strides = array<i32>} : memref<64x128xf32, #tpu.memory_space<vmem>>, vector<64x128xf32>,
    return
  }
}

</mosaic_0001>

<bundles_post_ra>
// kernel: _lambda_.1
= control target key start
LH: loop header
LB: loop body
LE: loop exit
PB: predicated region body
PF: predicated region fallthrough
CT: control target
= control target key end

     0   :  { %vm63_vm0 = vcmask 154624   ;;  %vm88_vm1 = vcmask 1042432   ;;  %v2778_v14 = vmov 0.0|0.0   ;;  %vm2779_vm2 = vmmov 0   ;;  %s2782_s21 = smov 32   ;;  %s3353_s3 = inlined_call_operand.vmem [shape: f32[19,128], index: 3, kind: input, shape index: {}]   ;;  %s3354_s0 = inlined_call_operand.vmem [shape: f32[64,19], index: 0, kind: input, shape index: {}]   ;;  %s3355_s4 = inlined_call_operand.vmem [shape: f32[32,128], index: 4, kind: input, shape index: {}]   ;;  %s3356_s1 = inlined_call_operand.vmem [shape: f32[2,8,32], index: 1, kind: input, shape index: {}]   ;;  %s3357_s5 = inlined_call_operand.vmem [shape: f32[1,128], index: 5, kind: input, shape index: {}]   ;;  %s3358_s2 = inlined_call_operand.vmem [shape: f32[2,8,32], index: 2, kind: input, shape index: {}]   ;;  %s3359_s6 = inlined_call_operand.vmem [shape: f32[32,128], index: 6, kind: input, shape index: {}]   ;;  %s3360_s7 = inlined_call_operand.vmem [shape: f32[32,128], index: 7, kind: input, shape index: {}]   ;;  %s3361_s8 = inlined_call_operand.vmem [shape: f32[1,128], index: 8, kind: input, shape index: {}]   ;;  %s3362_s12 = inlined_call_operand.vmem [shape: f32[2,8,32], index: 12, kind: output, shape index: {1}]   ;;  %s3363_s9 = inlined_call_operand.vmem [shape: f32[32,128], index: 9, kind: input, shape index: {}]   ;;  %s3364_s10 = inlined_call_operand.vmem [shape: f32[1,128], index: 10, kind: input, shape index: {}]   ;;  %s3365_s11 = inlined_call_operand.vmem [shape: f32[64,128], index: 11, kind: output, shape index: {0}]   ;;  %s3366_s13 = inlined_call_operand.vmem [shape: f32[2,8,32], index: 13, kind: output, shape index: {2}]  }
   0x1   :  { %v49_v0 = vld [vmem:[%s3353_s3] sm:$0xff]  ;;  %v50_v1 = vld [vmem:[%s3353_s3 + $0x8] sm:$0xff]  ;;  %v51_v4 = vld [vmem:[%s3353_s3 + $0x10] sm:$0x7]  ;;  %v2780_v17 = vmov 0.0   ;;  %vm199_vm3 = vcmask 261120   ;;  %v281_v32 = vlaneseq }
   0x2   :  { %v2524_v2 = vpack.c.bf16 %v50_v1, %v49_v0  ;;  %v45_v3 = vld [vmem:[%s3354_s0 + $0x20] sm:$0xff]  ;;  %v53_v6 = vld [vmem:[%s3355_s4 + $0x8] sm:$0xff]  ;;  %v47_v10 = vld [vmem:[%s3354_s0 + $0x30] sm:$0xff] }
   0x3   :  { %2302 = vmatprep.mubr.msk.f32.mxu1 %vm63_vm0, %v45_v3  ;;  %v52_v5 = vld [vmem:[%s3355_s4] sm:$0xff]  ;;  %v46_v8 = vld [vmem:[%s3354_s0 + $0x28] sm:$0xff]  ;;  %v54_v11 = vld [vmem:[%s3355_s4 + $0x10] sm:$0xff]  ;;  %v282_v34 = vand.u32 127, %v281_v32 }
   0x4   :  { %2640 = vmatprep.subr.bf16.mxu1 %v2524_v2  ;;  %2525 = vmatprep.subr.bf16.mxu0 %v2524_v2  ;;  %v41_v7 = vld [vmem:[%s3354_s0] sm:$0xff]  ;;  %v2881_v9 = vpack.c.bf16 %v53_v6, %v52_v5  ;;  %v55_v12 = vld [vmem:[%s3355_s4 + $0x18] sm:$0xff]  ;;  %v42_v13 = vld [vmem:[%s3354_s0 + $0x8] sm:$0xff] }
   0x5   :  { %2642 = vmatpush3.bf16.msra.mxu1 %v2524_v2  ;;  %2527 = vmatpush3.bf16.msra.mxu0 %v2524_v2  ;;  %v48_v15 = vld [vmem:[%s3354_s0 + $0x38] sm:$0xff]  ;;  %v2905_v16 = vpack.c.bf16 %v55_v12, %v54_v11  ;;  %v197_v18 = vld [vmem:[%s3356_s1] sm:$0xff]  ;;  %vm283_vm4 = vcmp.ge.s32.totalorder %v282_v34, 64  ;;  %vm284_vm5 = vcmp.lt.s32.totalorder %v282_v34, 96  ;;  %v43_v1 = vld [vmem:[%s3354_s0 + $0x10] sm:$0xff] }
   0x6   :  { %2641 = vmatprep.subr.msk.mxu1 %vm88_vm1, %v51_v4  ;;  %2294 = vmatprep.subr.msk.mxu0 %vm88_vm1, %v51_v4  ;;  %v2936_v23 = vld [vmem:[%s3357_s5] ss:$0 sm:$0xff]  ;;  %vm2943_vm6 = vmand %vm283_vm4, %vm284_vm5  ;;  %s2781_s5 = smov 64   ;;  %v44_v2 = vld [vmem:[%s3354_s0 + $0x18] sm:$0xff] }
   0x7   :  { %2296 = vmatprep.mubr.msk.f32.mxu0 %vm63_vm0, %v41_v7  ;;  %v198_v39 = vld [vmem:[%s3358_s2] sm:$0xff] }
   0x9   :  { %2643 = vmatpush3.msk.msra.mxu1 %vm88_vm1, %v51_v4  ;;  %2295 = vmatpush3.msk.msra.mxu0 %vm88_vm1, %v51_v4 }
   0xa   :  { %2303 = vmatmul.mubr.msk.f32.vlgmr.msra.gmra.mrb[0].mxu1 %vm63_vm0, %v46_v8  ;;  %2528 = vmatprep.subr.bf16.mxu1 %v2778_v14 }
   0xb   :  { %2530 = vmatpush3.bf16.msra.mxu1 %v2881_v9  ;;  %2305 = vmatprep.mubr.msk.f32.mxu1 %vm63_vm0, %v47_v10 }
   0xc   :  { %2531 = vmatprep.subr.bf16.mxu1 %v2778_v14  ;;  %2297 = vmatmul.mubr.msk.f32.vlgmr.msra.gmra.mrb[0].mxu0 %vm63_vm0, %v42_v13 }
   0xd   :  { %2540 = vmatprep.subr.bf16.mxu0 %v2778_v14  ;;  %2299 = vmatprep.mubr.msk.f32.mxu0 %vm63_vm0, %v43_v1 }
   0xe   :  { %2306 = vmatmul.mubr.msk.f32.gmra.mrb[2].mxu1 %vm63_vm0, %v48_v15  ;;  %2542 = vmatpush3.bf16.msra.mxu0 %v2881_v9 }
   0xf   :  { %2533 = vmatpush3.bf16.msra.mxu1 %v2905_v16  ;;  %2316 = vmatprep.mubr.msk.f32.mxu1 %vm2779_vm2, %v2780_v17 }
  0x10   :  { %2534 = vmatprep.subr.bf16.mxu1 %v2778_v14  ;;  %2543 = vmatprep.subr.bf16.mxu0 %v2778_v14 }
  0x11   :  { %2300 = vmatmul.mubr.msk.f32.gmra.mrb[2].mxu0 %vm63_vm0, %v44_v2 }
  0x12   :  { %2317 = vmatmul.mubr.msk.f32.vlgmr.msra.gmra.mrb[4].mxu1 %vm199_vm3, %v197_v18  ;;  %2545 = vmatpush3.bf16.msra.mxu0 %v2905_v16 }
  0x13   :  { %2536 = vmatpush3.bf16.msra.mxu1 %v2881_v9  ;;  %2327 = vmatprep.mubr.msk.f32.mxu1 %vm2779_vm2, %v2780_v17 }
  0x14   :  { %2537 = vmatprep.subr.bf16.mxu1 %v2778_v14  ;;  %2552 = vmatprep.subr.bf16.mxu0 %v2778_v14 }
  0x15   :  { %2338 = vmatprep.mubr.msk.f32.mxu0 %vm2779_vm2, %v2780_v17 }
  0x17   :  { %2539 = vmatpush3.bf16.msra.mxu1 %v2905_v16 }
  0x18   :  { %2546 = vmatprep.subr.bf16.mxu1 %v2778_v14 }
  0xdd   :  { %v2929_v19 = vpop.f32.mrb[0].mxu1 }
  0xde   :  { %v2931_v20 = vpop.f32.mrb[1].mxu1 }
  0xdf   :  { %v2298_v21 = vpop.f32.mrb[0].mxu0 }
  0xe0   :  { %v158_v22 = vpop.f32.mrb[1].mxu0  ;;  %v164_v50 = vadd.f32 %v2298_v21, %v2936_v23 }
  0xe1   :  { %v2938_v24 = vpop.f32.mrb[2].mxu1  ;;  %v159_v26 = vadd.f32 %v2936_v23, %v158_v22 }
  0xe2   :  { %v2940_v25 = vpop.f32.mrb[3].mxu1 }
  0xe4   :  { %v2301_v6 = vpop.f32.mrb[2].mxu0 }
  0xe5   :  { %v269_v27 = vpop.f32.mrb[4].mxu1  ;;  %v168_v7 = vpop.f32.mrb[3].mxu0 }
  0xe6   :  { %v273_v28 = vadd.f32 %v269_v27, %v159_v26  ;;  %v2318_v29 = vpop.f32.mrb[5].mxu1  ;;  %v169_v10 = vadd.f32 %v2936_v23, %v168_v7 }
  0xe8   :  { %v2122_v30 = vmul.f32 -1.442695, %v273_v28 }
  0xea   :  { %2650 = vpow2.f32 %v2122_v30 }
  0xeb   :  { %2652 = vtanh.f32 %v273_v28 }
  0xf4   :  { %v2651_v31 = vpop.eup %2650 }
  0xf5   :  { %v277_v33 = vadd.f32 1.0, %v2651_v31  ;;  %v2653_v36 = vpop.eup %2652 }
  0xf7   :  { %2654 = vrcp.f32 %v277_v33 }
 0x101   :  { %v2655_v37 = vpop.eup %2654 }
 0x102   :  { %v286_v38 = vsel %vm2943_vm6, %v2653_v36, %v2655_v37 }
 0x103   :  { %293 = vrot.lane.b32.xlu0 %v286_v38, %s2781_s5 }
 0x107   :  { %288 = vrot.lane.b32.xlu0 %v198_v39, %s2782_s21 }
 0x175   :  { %v294_v40 = vpop.permute.xlu0 %293 }
 0x176   :  { %v296_v41 = vmul.f32 %v294_v40, %v286_v38 }
 0x178   :  { %298 = vrot.lane.b32.xlu1 %v296_v41, %s2782_s21 }
 0x179   :  { %v289_v42 = vpop.permute.xlu0 %288 }
 0x17a   :  { %v291_v43 = vmul.f32 %v289_v42, %v286_v38 }
 0x1ea   :  { %v299_v44 = vpop.permute.xlu1 %298 }
 0x1eb   :  { %v301_v45 = vadd.f32 %v299_v44, %v291_v43 }
 0x1ed   :  { %2656 = vtanh.f32 %v301_v45 }
 0x1f7   :  { %v2657_v46 = vpop.eup %2656 }
 0x1f8   :  { %304 = vrot.lane.b32.xlu1 %v2657_v46, %s2781_s5 }
 0x26a   :  { %v305_v47 = vpop.permute.xlu1 %304 }
 0x26b   :  { %v307_v48 = vmul.f32 %v305_v47, %v286_v38  ;;  %v174_v38 = vadd.f32 %v2301_v6, %v2936_v23 }
 0x26d   :  { %309 = vrot.lane.b32.xlu0 %v307_v48, %s2782_s21 }
 0x2df   :  { %v2957_v49 = vpop.permute.xlu0 %309 }
 0x2e0   :  { %2328 = vmatmul.mubr.msk.f32.vlgmr.msra.gmra.mrb[6].mxu1 %vm199_vm3, %v2957_v49 }
 0x2e1   :  { %2548 = vmatpush3.bf16.msra.mxu1 %v2881_v9  ;;  %2349 = vmatprep.mubr.msk.f32.mxu1 %vm2779_vm2, %v2780_v17 }
 0x2e2   :  { %2549 = vmatprep.subr.bf16.mxu1 %v2778_v14 }
 0x2e5   :  { %2551 = vmatpush3.bf16.msra.mxu1 %v2905_v16 }
 0x2e6   :  { %2558 = vmatprep.subr.bf16.mxu1 %v2778_v14 }
 0x3b3   :  { %v379_v51 = vpop.f32.mrb[6].mxu1 }
 0x3b4   :  { %v383_v52 = vadd.f32 %v379_v51, %v164_v50  ;;  %v2329_v53 = vpop.f32.mrb[7].mxu1 }
 0x3b6   :  { %v2124_v54 = vmul.f32 -1.442695, %v383_v52 }
 0x3b8   :  { %2658 = vpow2.f32 %v2124_v54 }
 0x3b9   :  { %2660 = vtanh.f32 %v383_v52 }
 0x3c2   :  { %v2659_v55 = vpop.eup %2658 }
 0x3c3   :  { %v387_v56 = vadd.f32 1.0, %v2659_v55  ;;  %v2661_v57 = vpop.eup %2660 }
 0x3c5   :  { %2662 = vrcp.f32 %v387_v56 }
 0x3cf   :  { %v2663_v58 = vpop.eup %2662 }
 0x3d0   :  { %v391_v59 = vsel %vm2943_vm6, %v2661_v57, %v2663_v58  ;;  %v179_v58 = vadd.f32 %v2936_v23, %v2931_v20 }
 0x3d1   :  { %394 = vrot.lane.b32.xlu1 %v391_v59, %s2781_s5  ;;  %v392_v62 = vmul.f32 %v391_v59, %v301_v45 }
 0x443   :  { %v395_v60 = vpop.permute.xlu1 %394 }
 0x444   :  { %v397_v61 = vmul.f32 %v395_v60, %v391_v59 }
 0x446   :  { %399 = vrot.lane.b32.xlu0 %v397_v61, %s2782_s21 }
 0x4b8   :  { %v400_v63 = vpop.permute.xlu0 %399 }
 0x4b9   :  { %v402_v0 = vadd.f32 %v400_v63, %v392_v62 }
 0x4bb   :  { %2664 = vtanh.f32 %v402_v0 }
 0x4c5   :  { %v2665_v3 = vpop.eup %2664 }
 0x4c6   :  { %405 = vrot.lane.b32.xlu1 %v2665_v3, %s2781_s5 }
 0x538   :  { %v406_v4 = vpop.permute.xlu1 %405 }
 0x539   :  { %v408_v5 = vmul.f32 %v406_v4, %v391_v59 }
 0x53b   :  { %410 = vrot.lane.b32.xlu0 %v408_v5, %s2782_s21 }
 0x5ad   :  { %v2984_v8 = vpop.permute.xlu0 %410 }
 0x5ae   :  { %2339 = vmatmul.mubr.msk.f32.vlgmr.msra.gmra.mrb[4].mxu0 %vm199_vm3, %v2984_v8 }
 0x5af   :  { %2554 = vmatpush3.bf16.msra.mxu0 %v2881_v9  ;;  %2360 = vmatprep.mubr.msk.f32.mxu0 %vm2779_vm2, %v2780_v17 }
 0x5b0   :  { %2555 = vmatprep.subr.bf16.mxu0 %v2778_v14 }
 0x5b3   :  { %2557 = vmatpush3.bf16.msra.mxu0 %v2905_v16 }
 0x5b4   :  { %2564 = vmatprep.subr.bf16.mxu0 %v2778_v14 }
 0x681   :  { %v480_v11 = vpop.f32.mrb[4].mxu0 }
 0x682   :  { %v484_v12 = vadd.f32 %v480_v11, %v169_v10  ;;  %v2340_v13 = vpop.f32.mrb[5].mxu0 }
 0x684   :  { %v2126_v15 = vmul.f32 -1.442695, %v484_v12 }
 0x686   :  { %2666 = vpow2.f32 %v2126_v15  ;;  %v184_v15 = vadd.f32 %v2929_v19, %v2936_v23 }
 0x687   :  { %2668 = vtanh.f32 %v484_v12 }
 0x690   :  { %v2667_v18 = vpop.eup %2666 }
 0x691   :  { %v488_v21 = vadd.f32 1.0, %v2667_v18  ;;  %v2669_v22 = vpop.eup %2668 }
 0x693   :  { %2670 = vrcp.f32 %v488_v21 }
 0x69d   :  { %v2671_v26 = vpop.eup %2670 }
 0x69e   :  { %v492_v27 = vsel %vm2943_vm6, %v2669_v22, %v2671_v26 }
 0x69f   :  { %495 = vrot.lane.b32.xlu1 %v492_v27, %s2781_s5  ;;  %v493_v30 = vmul.f32 %v492_v27, %v402_v0 }
 0x711   :  { %v496_v28 = vpop.permute.xlu1 %495 }
 0x712   :  { %v498_v29 = vmul.f32 %v496_v28, %v492_v27 }
 0x714   :  { %500 = vrot.lane.b32.xlu0 %v498_v29, %s2782_s21 }
 0x786   :  { %v501_v31 = vpop.permute.xlu0 %500 }
 0x787   :  { %v503_v32 = vadd.f32 %v501_v31, %v493_v30 }
 0x789   :  { %2672 = vtanh.f32 %v503_v32 }
 0x793   :  { %v2673_v33 = vpop.eup %2672 }
 0x794   :  { %506 = vrot.lane.b32.xlu1 %v2673_v33, %s2781_s5 }
 0x806   :  { %v507_v34 = vpop.permute.xlu1 %506 }
 0x807   :  { %v509_v36 = vmul.f32 %v507_v34, %v492_v27  ;;  %v1025_v34 = vld [vmem:[%s3359_s6] sm:$0xff] }
 0x809   :  { %511 = vrot.lane.b32.xlu0 %v509_v36, %s2782_s21  ;;  %v1026_v36 = vld [vmem:[%s3359_s6 + $0x8] sm:$0xff] }
 0x87b   :  { %v3001_v37 = vpop.permute.xlu0 %511 }
 0x87c   :  { %2350 = vmatmul.mubr.msk.f32.vlgmr.msra.gmra.mrb[8].mxu1 %vm199_vm3, %v3001_v37 }
 0x87d   :  { %2560 = vmatpush3.bf16.msra.mxu1 %v2881_v9  ;;  %2371 = vmatprep.mubr.msk.f32.mxu1 %vm2779_vm2, %v2780_v17 }
 0x87e   :  { %2561 = vmatprep.subr.bf16.mxu1 %v2778_v14 }
 0x881   :  { %2563 = vmatpush3.bf16.msra.mxu1 %v2905_v16 }
 0x882   :  { %2570 = vmatprep.subr.bf16.mxu1 %v2778_v14 }
 0x94f   :  { %v581_v39 = vpop.f32.mrb[8].mxu1 }
 0x950   :  { %v585_v40 = vadd.f32 %v581_v39, %v174_v38  ;;  %v2351_v41 = vpop.f32.mrb[9].mxu1  ;;  %v2576_v38 = vpack.c.bf16 %v1026_v36, %v1025_v34 }
 0x952   :  { %v2128_v42 = vmul.f32 -1.442695, %v585_v40 }
 0x954   :  { %2674 = vpow2.f32 %v2128_v42  ;;  %v1027_v42 = vld [vmem:[%s3359_s6 + $0x10] sm:$0xff] }
 0x955   :  { %2676 = vtanh.f32 %v585_v40 }
 0x95e   :  { %v2675_v43 = vpop.eup %2674 }
 0x95f   :  { %v589_v44 = vadd.f32 1.0, %v2675_v43  ;;  %v2677_v45 = vpop.eup %2676  ;;  %v1028_v43 = vld [vmem:[%s3359_s6 + $0x18] sm:$0xff] }
 0x961   :  { %2678 = vrcp.f32 %v589_v44  ;;  %v2580_v44 = vpack.c.bf16 %v1028_v43, %v1027_v42 }
 0x96b   :  { %v2679_v46 = vpop.eup %2678 }
 0x96c   :  { %v593_v47 = vsel %vm2943_vm6, %v2677_v45, %v2679_v46 }
 0x96d   :  { %596 = vrot.lane.b32.xlu1 %v593_v47, %s2781_s5  ;;  %v594_v51 = vmul.f32 %v593_v47, %v503_v32 }
 0x9df   :  { %v597_v48 = vpop.permute.xlu1 %596 }
 0x9e0   :  { %v599_v50 = vmul.f32 %v597_v48, %v593_v47 }
 0x9e2   :  { %601 = vrot.lane.b32.xlu0 %v599_v50, %s2782_s21 }
 0xa54   :  { %v602_v52 = vpop.permute.xlu0 %601 }
 0xa55   :  { %v604_v53 = vadd.f32 %v602_v52, %v594_v51 }
 0xa57   :  { %2680 = vtanh.f32 %v604_v53 }
 0xa61   :  { %v2681_v54 = vpop.eup %2680 }
 0xa62   :  { %607 = vrot.lane.b32.xlu1 %v2681_v54, %s2781_s5 }
 0xad4   :  { %v608_v55 = vpop.permute.xlu1 %607 }
 0xad5   :  { %v610_v56 = vmul.f32 %v608_v55, %v593_v47 }
 0xad7   :  { %612 = vrot.lane.b32.xlu0 %v610_v56, %s2782_s21 }
 0xb49   :  { %v3018_v57 = vpop.permute.xlu0 %612 }
 0xb4a   :  { %2361 = vmatmul.mubr.msk.f32.vlgmr.msra.gmra.mrb[6].mxu0 %vm199_vm3, %v3018_v57 }
 0xb4b   :  { %2566 = vmatpush3.bf16.msra.mxu0 %v2881_v9  ;;  %2382 = vmatprep.mubr.msk.f32.mxu0 %vm2779_vm2, %v2780_v17 }
 0xb4c   :  { %2567 = vmatprep.subr.bf16.mxu0 %v2778_v14 }
 0xb4f   :  { %2569 = vmatpush3.bf16.msra.mxu0 %v2905_v16 }
 0xb50   :  { %2577 = vmatprep.subr.bf16.mxu0 %v2576_v38 }
 0xc1d   :  { %v682_v59 = vpop.f32.mrb[6].mxu0 }
 0xc1e   :  { %v686_v60 = vadd.f32 %v682_v59, %v179_v58  ;;  %v2362_v61 = vpop.f32.mrb[7].mxu0 }
 0xc20   :  { %v2130_v62 = vmul.f32 -1.442695, %v686_v60 }
 0xc22   :  { %2682 = vpow2.f32 %v2130_v62 }
 0xc23   :  { %2684 = vtanh.f32 %v686_v60 }
 0xc2c   :  { %v2683_v63 = vpop.eup %2682 }
 0xc2d   :  { %v690_v0 = vadd.f32 1.0, %v2683_v63  ;;  %v2685_v1 = vpop.eup %2684 }
 0xc2f   :  { %2686 = vrcp.f32 %v690_v0 }
 0xc39   :  { %v2687_v2 = vpop.eup %2686 }
 0xc3a   :  { %v694_v3 = vsel %vm2943_vm6, %v2685_v1, %v2687_v2  ;;  %v1029_v1 = vld [vmem:[%s3360_s7] sm:$0xff]  ;;  %v1030_v2 = vld [vmem:[%s3360_s7 + $0x8] sm:$0xff] }
 0xc3b   :  { %697 = vrot.lane.b32.xlu1 %v694_v3, %s2781_s5  ;;  %v695_v20 = vmul.f32 %v694_v3, %v604_v53 }
 0xcad   :  { %v698_v4 = vpop.permute.xlu1 %697 }
 0xcae   :  { %v700_v5 = vmul.f32 %v698_v4, %v694_v3  ;;  %v1031_v4 = vld [vmem:[%s3360_s7 + $0x10] sm:$0xff] }
 0xcb0   :  { %702 = vrot.lane.b32.xlu0 %v700_v5, %s2782_s21  ;;  %v1032_v5 = vld [vmem:[%s3360_s7 + $0x18] sm:$0xff] }
 0xd22   :  { %v703_v6 = vpop.permute.xlu0 %702 }
 0xd23   :  { %v705_v7 = vadd.f32 %v703_v6, %v695_v20  ;;  %v3110_v20 = vpack.c.bf16 %v1032_v5, %v1031_v4 }
 0xd25   :  { %2688 = vtanh.f32 %v705_v7 }
 0xd2f   :  { %v2689_v10 = vpop.eup %2688 }
 0xd30   :  { %708 = vrot.lane.b32.xlu1 %v2689_v10, %s2781_s5  ;;  %v2147_v10 = vld [vmem:[%s3358_s2 + $0x8] sm:$0xff] }
 0xda2   :  { %v709_v11 = vpop.permute.xlu1 %708 }
 0xda3   :  { %v711_v12 = vmul.f32 %v709_v11, %v694_v3  ;;  %v3100_v3 = vpack.c.bf16 %v1030_v2, %v1029_v1 }
 0xda5   :  { %713 = vrot.lane.b32.xlu0 %v711_v12, %s2782_s21  ;;  %v2146_v12 = vld [vmem:[%s3356_s1 + $0x8] sm:$0xff]  ;;  %s2783_s1 = smov 96  }
 0xe17   :  { %v714_v13 = vpop.permute.xlu0 %713 }
 0xe18   :  { %2372 = vmatmul.mubr.msk.f32.vlgmr.msra.gmra.mrb[10].mxu1 %vm199_vm3, %v714_v13 }
 0xe19   :  { %2572 = vmatpush3.bf16.msra.mxu1 %v2881_v9  ;;  %2393 = vmatprep.mubr.msk.f32.mxu1 %vm2779_vm2, %v2780_v17 }
 0xe1a   :  { %2573 = vmatprep.subr.bf16.mxu1 %v2778_v14 }
 0xe1d   :  { %2575 = vmatpush3.bf16.msra.mxu1 %v2905_v16 }
 0xe1e   :  { %2584 = vmatprep.subr.bf16.mxu1 %v2778_v14 }
 0xeeb   :  { %v783_v18 = vpop.f32.mrb[10].mxu1 }
 0xeec   :  { %v787_v21 = vadd.f32 %v783_v18, %v184_v15  ;;  %v2373_v22 = vpop.f32.mrb[11].mxu1 }
 0xeed   :  { %v3142_v22 = vld [vmem:[%s3361_s8] ss:$0 sm:$0xff] }
 0xeee   :  { %v2132_v26 = vmul.f32 -1.442695, %v787_v21 }
 0xef0   :  { %2690 = vpow2.f32 %v2132_v26 }
 0xef1   :  { %2692 = vtanh.f32 %v787_v21 }
 0xefa   :  { %v2691_v27 = vpop.eup %2690 }
 0xefb   :  { %v791_v28 = vadd.f32 1.0, %v2691_v27  ;;  %v2693_v9 = vpop.eup %2692 }
 0xefd   :  { %2694 = vrcp.f32 %v791_v28 }
 0xf07   :  { %v2695_v29 = vpop.eup %2694 }
 0xf08   :  { %v795_v30 = vsel %vm2943_vm6, %v2693_v9, %v2695_v29 }
 0xf09   :  { %798 = vrot.lane.b32.xlu1 %v795_v30, %s2781_s5  ;;  %v796_v19 = vmul.f32 %v795_v30, %v705_v7 }
 0xf7b   :  { %v799_v16 = vpop.permute.xlu1 %798 }
 0xf7c   :  { %v801_v31 = vmul.f32 %v799_v16, %v795_v30 }
 0xf7e   :  { %803 = vrot.lane.b32.xlu0 %v801_v31, %s2782_s21 }
 0xff0   :  { %v804_v32 = vpop.permute.xlu0 %803 }
 0xff1   :  { %v806_v33 = vadd.f32 %v804_v32, %v796_v19 }
 0xff3   :  { %2696 = vtanh.f32 %v806_v33 }
 0xffd   :  { %v2697_v39 = vpop.eup %2696 }
 0xffe   :  { %809 = vrot.lane.b32.xlu1 %v2697_v39, %s2781_s5 }
0x1070   :  { %v810_v40 = vpop.permute.xlu1 %809 }
0x1071   :  { %v812_v41 = vmul.f32 %v810_v40, %v795_v30 }
0x1073   :  { %814 = vrot.lane.b32.xlu0 %v812_v41, %s2782_s21 }
0x10e5   :  { %v815_v45 = vpop.permute.xlu0 %814 }
0x10e6   :  { %2383 = vmatmul.mubr.msk.f32.vlgmr.msra.gmra.mrb[8].mxu0 %vm199_vm3, %v815_v45 }
0x10e7   :  { %2579 = vmatpush3.bf16.msra.mxu0 %v2576_v38  ;;  %2404 = vmatprep.mubr.msk.f32.mxu0 %vm199_vm3, %v2957_v49  ;;  %v189_v49 = vadd.f32 %v2936_v23, %v2940_v25 }
0x10e8   :  { %2581 = vmatprep.subr.bf16.mxu0 %v2580_v44 }
0x10eb   :  { %2583 = vmatpush3.bf16.msra.mxu0 %v2580_v44 }
0x10ec   :  { %2596 = vmatprep.subr.bf16.mxu0 %v2778_v14 }
0x10ee   :  { %2405 = vmatmul.mubr.msk.f32.vlgmr.msra.gmra.mrb[10].mxu0 %vm199_vm3, %v2984_v8 }
0x10ef   :  { %2407 = vmatprep.mubr.msk.f32.mxu0 %vm199_vm3, %v3001_v37  ;;  %2598 = vmatpush3.bf16.msra.mxu0 %v3100_v3 }
0x10f0   :  { %2599 = vmatprep.subr.bf16.mxu0 %v2778_v14 }
0x10f2   :  { %2408 = vmatmul.mubr.msk.f32.gmra.mrb[12].mxu0 %vm199_vm3, %v3018_v57 }
0x10f3   :  { %2410 = vmatprep.mubr.msk.f32.mxu0 %vm199_vm3, %v714_v13  ;;  %2601 = vmatpush3.bf16.msra.mxu0 %v3110_v20  ;;  %v194_v13 = vadd.f32 %v2938_v24, %v2936_v23 }
0x10f4   :  { %2608 = vmatprep.subr.bf16.mxu0 %v2778_v14 }
0x10f6   :  { %2411 = vmatmul.mubr.msk.f32.gmra.mrb[14].mxu0 %vm199_vm3, %v815_v45 }
0x11b9   :  { %v884_v46 = vpop.f32.mrb[8].mxu0 }
0x11ba   :  { %v888_v47 = vadd.f32 %v884_v46, %v189_v49  ;;  %v2384_v48 = vpop.f32.mrb[9].mxu0 }
0x11bc   :  { %v2134_v50 = vmul.f32 -1.442695, %v888_v47 }
0x11be   :  { %2698 = vpow2.f32 %v2134_v50 }
0x11bf   :  { %2700 = vtanh.f32 %v888_v47 }
0x11c1   :  { %v3076_v51 = vpop.f32.mrb[10].mxu0 }
0x11c2   :  { %v1108_v8 = vpop.f32.mrb[11].mxu0 }
0x11c3   :  { %v1109_v26 = vadd.f32 %v3142_v22, %v1108_v8 }
0x11c5   :  { %v3078_v52 = vpop.f32.mrb[12].mxu0 }
0x11c6   :  { %v3080_v37 = vpop.f32.mrb[13].mxu0 }
0x11c8   :  { %v2699_v53 = vpop.eup %2698 }
0x11c9   :  { %v892_v54 = vadd.f32 1.0, %v2699_v53  ;;  %v3082_v55 = vpop.f32.mrb[14].mxu0  ;;  %v2701_v25 = vpop.eup %2700 }
0x11ca   :  { %v3084_v56 = vpop.f32.mrb[15].mxu0 }
0x11cb   :  { %2702 = vrcp.f32 %v892_v54 }
0x11d5   :  { %v2703_v57 = vpop.eup %2702 }
0x11d6   :  { %v896_v58 = vsel %vm2943_vm6, %v2701_v25, %v2703_v57 }
0x11d7   :  { %899 = vrot.lane.b32.xlu1 %v896_v58, %s2781_s5  ;;  %v897_v61 = vmul.f32 %v896_v58, %v806_v33 }
0x1249   :  { %v900_v59 = vpop.permute.xlu1 %899 }
0x124a   :  { %v902_v60 = vmul.f32 %v900_v59, %v896_v58  ;;  %v1114_v59 = vadd.f32 %v3076_v51, %v3142_v22 }
0x124c   :  { %904 = vrot.lane.b32.xlu0 %v902_v60, %s2782_s21 }
0x12be   :  { %v905_v62 = vpop.permute.xlu0 %904 }
0x12bf   :  { %v3090_v63 = vadd.f32 %v905_v62, %v897_v61 }
0x12c1   :  { %2704 = vtanh.f32 %v3090_v63 }
0x12cb   :  { %v2705_v0 = vpop.eup %2704 }
0x12cc   :  { %910 = vrot.lane.b32.xlu1 %v2705_v0, %s2781_s5 }
0x133e   :  { %v911_v6 = vpop.permute.xlu1 %910 }
0x133f   :  { %v913_v7 = vmul.f32 %v911_v6, %v896_v58 }
0x1341   :  { %915 = vrot.lane.b32.xlu0 %v913_v7, %s2782_s21 }
0x1345   :  { %1234 = vrot.lane.b32.xlu0 %v2147_v10, %s2782_s21 }
0x13b3   :  { %v916_v11 = vpop.permute.xlu0 %915 }
0x13b4   :  { %2394 = vmatmul.mubr.msk.f32.vlgmr.msra.gmra.mrb[12].mxu1 %vm199_vm3, %v916_v11  ;;  %2413 = vmatprep.mubr.msk.f32.mxu0 %vm199_vm3, %v916_v11 }
0x13b5   :  { %2586 = vmatpush3.bf16.msra.mxu1 %v3100_v3  ;;  %2424 = vmatprep.mubr.msk.f32.mxu1 %vm2779_vm2, %v2780_v17 }
0x13b6   :  { %2587 = vmatprep.subr.bf16.mxu1 %v2778_v14 }
0x13b7   :  { %v1235_v34 = vpop.permute.xlu0 %1234 }
0x13b9   :  { %2589 = vmatpush3.bf16.msra.mxu1 %v3110_v20 }
0x13ba   :  { %2590 = vmatprep.subr.bf16.mxu1 %v2778_v14 }
0x13bc   :  { %2425 = vmatmul.mubr.msk.f32.vlgmr.msra.gmra.mrb[14].mxu1 %vm199_vm3, %v2146_v12 }
0x13bd   :  { %2592 = vmatpush3.bf16.msra.mxu1 %v3100_v3  ;;  %2435 = vmatprep.mubr.msk.f32.mxu1 %vm2779_vm2, %v2780_v17 }
0x13be   :  { %2593 = vmatprep.subr.bf16.mxu1 %v2778_v14 }
0x13c1   :  { %2595 = vmatpush3.bf16.msra.mxu1 %v3110_v20 }
0x13c2   :  { %2602 = vmatprep.subr.bf16.mxu1 %v2778_v14 }
0x1487   :  { %v985_v15 = vpop.f32.mrb[12].mxu1 }
0x1488   :  { %v989_v18 = vadd.f32 %v985_v15, %v194_v13  ;;  %v2395_v21 = vpop.f32.mrb[13].mxu1 }
0x148a   :  { %v2136_v33 = vmul.f32 -1.442695, %v989_v18 }
0x148f   :  { %v1220_v27 = vpop.f32.mrb[14].mxu1 }
0x1490   :  { %v1224_v28 = vadd.f32 %v1220_v27, %v1109_v26  ;;  %v2426_v9 = vpop.f32.mrb[15].mxu1 }
0x1492   :  { %v2149_v29 = vmul.f32 -1.442695, %v1224_v28 }
0x1494   :  { %2706 = vpow2.f32 %v2149_v29 }
0x1495   :  { %2708 = vtanh.f32 %v1224_v28  ;;  %v1119_v28 = vadd.f32 %v3142_v22, %v3080_v37 }
0x149e   :  { %v2707_v30 = vpop.eup %2706 }
0x149f   :  { %v1228_v16 = vadd.f32 1.0, %v2707_v30  ;;  %v2709_v23 = vpop.eup %2708 }
0x14a1   :  { %2710 = vrcp.f32 %v1228_v16 }
0x14a2   :  { %2712 = vpow2.f32 %v2136_v33 }
0x14ab   :  { %v2711_v24 = vpop.eup %2710 }
0x14ac   :  { %v1232_v31 = vsel %vm2943_vm6, %v2709_v23, %v2711_v24  ;;  %v2713_v36 = vpop.eup %2712 }
0x14ad   :  { %1239 = vrot.lane.b32.xlu1 %v1232_v31, %s2781_s5  ;;  %v1237_v38 = vmul.f32 %v1235_v34, %v1232_v31  ;;  %v993_v39 = vadd.f32 1.0, %v2713_v36 }
0x151f   :  { %v1240_v19 = vpop.permute.xlu1 %1239 }
0x1520   :  { %v1242_v32 = vmul.f32 %v1240_v19, %v1232_v31 }
0x1522   :  { %1244 = vrot.lane.b32.xlu1 %v1242_v32, %s2782_s21 }
0x1594   :  { %v1245_v40 = vpop.permute.xlu1 %1244 }
0x1595   :  { %v1247_v41 = vadd.f32 %v1245_v40, %v1237_v38 }
0x1597   :  { %2714 = vtanh.f32 %v1247_v41 }
0x1598   :  { %2716 = vrcp.f32 %v993_v39 }
0x1599   :  { %2718 = vtanh.f32 %v989_v18 }
0x15a1   :  { %v2715_v42 = vpop.eup %2714 }
0x15a2   :  { %v2717_v43 = vpop.eup %2716  ;;  %1250 = vrot.lane.b32.xlu0 %v2715_v42, %s2781_s5 }
0x15a3   :  { %v2719_v44 = vpop.eup %2718 }
0x15a4   :  { %v997_v45 = vsel %vm2943_vm6, %v2719_v44, %v2717_v43  ;;  %v1124_v43 = vadd.f32 %v3078_v52, %v3142_v22 }
0x15a5   :  { %v998_v8 = vmul.f32 %v997_v45, %v3090_v63 }
0x15a6   :  { %1000 = vrot.lane.b32.xlu0 %v997_v45, %s2781_s5 }
0x1614   :  { %v1251_v49 = vpop.permute.xlu0 %1250 }
0x1615   :  { %v1253_v46 = vmul.f32 %v1251_v49, %v1232_v31 }
0x1617   :  { %1255 = vrot.lane.b32.xlu1 %v1253_v46, %s2782_s21 }
0x1618   :  { %v1001_v47 = vpop.permute.xlu0 %1000 }
0x1619   :  { %v1003_v48 = vmul.f32 %v1001_v47, %v997_v45 }
0x161b   :  { %1005 = vrot.lane.b32.xlu0 %v1003_v48, %s2782_s21 }
0x1689   :  { %v3155_v50 = vpop.permute.xlu1 %1255 }
0x168a   :  { %2436 = vmatmul.mubr.msk.f32.vlgmr.msra.gmra.mrb[16].mxu1 %vm199_vm3, %v3155_v50 }
0x168b   :  { %2604 = vmatpush3.bf16.msra.mxu1 %v3100_v3  ;;  %2457 = vmatprep.mubr.msk.f32.mxu1 %vm2779_vm2, %v2780_v17 }
0x168c   :  { %2605 = vmatprep.subr.bf16.mxu1 %v2778_v14 }
0x168d   :  { %v1006_v53 = vpop.permute.xlu0 %1005 }
0x168e   :  { %v3164_v54 = vadd.f32 %v1006_v53, %v998_v8 }
0x168f   :  { %2607 = vmatpush3.bf16.msra.mxu1 %v3110_v20 }
0x1690   :  { %2720 = vtanh.f32 %v3164_v54  ;;  %2614 = vmatprep.subr.bf16.mxu1 %v2778_v14 }
0x169a   :  { %v2721_v25 = vpop.eup %2720 }
0x169b   :  { %1011 = vrot.lane.b32.xlu0 %v2721_v25, %s2781_s5 }
0x170d   :  { %v1012_v57 = vpop.permute.xlu0 %1011 }
0x170e   :  { %v1014_v58 = vmul.f32 %v1012_v57, %v997_v45 }
0x1710   :  { %1016 = vrot.lane.b32.xlu0 %v1014_v58, %s2782_s21 }
0x175d   :  { %v1325_v60 = vpop.f32.mrb[16].mxu1 }
0x175e   :  { %v1329_v61 = vadd.f32 %v1325_v60, %v1114_v59  ;;  %v2437_v62 = vpop.f32.mrb[17].mxu1 }
0x1760   :  { %v2151_v63 = vmul.f32 -1.442695, %v1329_v61 }
0x1762   :  { %2722 = vpow2.f32 %v2151_v63 }
0x1763   :  { %2724 = vtanh.f32 %v1329_v61 }
0x176c   :  { %v2723_v0 = vpop.eup %2722 }
0x176d   :  { %v1333_v1 = vadd.f32 1.0, %v2723_v0  ;;  %v2725_v2 = vpop.eup %2724 }
0x176f   :  { %2726 = vrcp.f32 %v1333_v1  ;;  %v1129_v1 = vadd.f32 %v3142_v22, %v3084_v56 }
0x1779   :  { %v2727_v4 = vpop.eup %2726 }
0x177a   :  { %v1337_v5 = vsel %vm2943_vm6, %v2725_v2, %v2727_v4 }
0x177b   :  { %1340 = vrot.lane.b32.xlu1 %v1337_v5, %s2781_s5  ;;  %v1338_v12 = vmul.f32 %v1337_v5, %v1247_v41 }
0x1782   :  { %v1017_v6 = vpop.permute.xlu0 %1016 }
0x1783   :  { %1019 = vst.msk [vmem:[%s3362_s12] sm:$0xff] %vm199_vm3, %v1017_v6  ;;  %2414 = vmatmul.mubr.msk.f32.gmra.mrb[16].mxu0 %vm199_vm3, %v1017_v6 }
0x1784   :  { %2446 = vmatprep.mubr.msk.f32.mxu0 %vm2779_vm2, %v2780_v17 }
0x17ed   :  { %v1341_v51 = vpop.permute.xlu1 %1340 }
0x17ee   :  { %v1343_v7 = vmul.f32 %v1341_v51, %v1337_v5 }
0x17f0   :  { %1345 = vrot.lane.b32.xlu1 %v1343_v7, %s2782_s21 }
0x1856   :  { %v3184_v10 = vpop.f32.mrb[16].mxu0 }
0x1857   :  { %v3186_v11 = vpop.f32.mrb[17].mxu0 }
0x1862   :  { %v1346_v13 = vpop.permute.xlu1 %1345 }
0x1863   :  { %v1348_v15 = vadd.f32 %v1346_v13, %v1338_v12 }
0x1865   :  { %2728 = vtanh.f32 %v1348_v15 }
0x186f   :  { %v2729_v18 = vpop.eup %2728 }
0x1870   :  { %1351 = vrot.lane.b32.xlu1 %v2729_v18, %s2781_s5 }
0x18e2   :  { %v1352_v21 = vpop.permute.xlu1 %1351 }
0x18e3   :  { %v1354_v26 = vmul.f32 %v1352_v21, %v1337_v5 }
0x18e5   :  { %1356 = vrot.lane.b32.xlu1 %v1354_v26, %s2782_s21 }
0x1957   :  { %v3190_v27 = vpop.permute.xlu1 %1356 }
0x1958   :  { %2447 = vmatmul.mubr.msk.f32.vlgmr.msra.gmra.mrb[18].mxu0 %vm199_vm3, %v3190_v27 }
0x1959   :  { %2610 = vmatpush3.bf16.msra.mxu0 %v3100_v3  ;;  %2468 = vmatprep.mubr.msk.f32.mxu0 %vm2779_vm2, %v2780_v17 }
0x195a   :  { %2611 = vmatprep.subr.bf16.mxu0 %v2778_v14 }
0x195d   :  { %2613 = vmatpush3.bf16.msra.mxu0 %v3110_v20 }
0x195e   :  { %2620 = vmatprep.subr.bf16.mxu0 %v2778_v14 }
0x1a2b   :  { %v1426_v9 = vpop.f32.mrb[18].mxu0 }
0x1a2c   :  { %v1430_v29 = vadd.f32 %v1426_v9, %v1119_v28  ;;  %v2448_v30 = vpop.f32.mrb[19].mxu0 }
0x1a2e   :  { %v2153_v16 = vmul.f32 -1.442695, %v1430_v29 }
0x1a30   :  { %2730 = vpow2.f32 %v2153_v16 }
0x1a31   :  { %2732 = vtanh.f32 %v1430_v29 }
0x1a3a   :  { %v2731_v23 = vpop.eup %2730 }
0x1a3b   :  { %v1434_v24 = vadd.f32 1.0, %v2731_v23  ;;  %v2733_v31 = vpop.eup %2732  ;;  %v1134_v23 = vadd.f32 %v3082_v55, %v3142_v22 }
0x1a3d   :  { %2734 = vrcp.f32 %v1434_v24 }
0x1a47   :  { %v2735_v19 = vpop.eup %2734 }
0x1a48   :  { %v1438_v32 = vsel %vm2943_vm6, %v2733_v31, %v2735_v19 }
0x1a49   :  { %1441 = vrot.lane.b32.xlu0 %v1438_v32, %s2781_s5  ;;  %v1439_v37 = vmul.f32 %v1438_v32, %v1348_v15 }
0x1abb   :  { %v1442_v33 = vpop.permute.xlu0 %1441 }
0x1abc   :  { %v1444_v34 = vmul.f32 %v1442_v33, %v1438_v32 }
0x1abe   :  { %1446 = vrot.lane.b32.xlu1 %v1444_v34, %s2782_s21 }
0x1b30   :  { %v1447_v36 = vpop.permute.xlu1 %1446 }
0x1b31   :  { %v1449_v38 = vadd.f32 %v1447_v36, %v1439_v37 }
0x1b33   :  { %2736 = vtanh.f32 %v1449_v38 }
0x1b3d   :  { %v2737_v39 = vpop.eup %2736 }
0x1b3e   :  { %1452 = vrot.lane.b32.xlu0 %v2737_v39, %s2781_s5  ;;  %v1973_v39 = vld [vmem:[%s3363_s9] sm:$0xff] }
0x1bb0   :  { %v1453_v40 = vpop.permute.xlu0 %1452 }
0x1bb1   :  { %v1455_v41 = vmul.f32 %v1453_v40, %v1438_v32  ;;  %v1974_v40 = vld [vmem:[%s3363_s9 + $0x8] sm:$0xff] }
0x1bb3   :  { %1457 = vrot.lane.b32.xlu1 %v1455_v41, %s2782_s21  ;;  %v2632_v41 = vpack.c.bf16 %v1974_v40, %v1973_v39 }
0x1c25   :  { %v3208_v42 = vpop.permute.xlu1 %1457 }
0x1c26   :  { %2458 = vmatmul.mubr.msk.f32.vlgmr.msra.gmra.mrb[18].mxu1 %vm199_vm3, %v3208_v42 }
0x1c27   :  { %2616 = vmatpush3.bf16.msra.mxu1 %v3100_v3  ;;  %2479 = vmatprep.mubr.msk.f32.mxu1 %vm2779_vm2, %v2780_v17 }
0x1c28   :  { %2617 = vmatprep.subr.bf16.mxu1 %v2778_v14 }
0x1c2b   :  { %2619 = vmatpush3.bf16.msra.mxu1 %v3110_v20 }
0x1c2c   :  { %2626 = vmatprep.subr.bf16.mxu1 %v2778_v14 }
0x1cf9   :  { %v1527_v44 = vpop.f32.mrb[18].mxu1 }
0x1cfa   :  { %v1531_v45 = vadd.f32 %v1527_v44, %v1124_v43  ;;  %v2459_v49 = vpop.f32.mrb[19].mxu1 }
0x1cfb   :  { %v1975_v49 = vld [vmem:[%s3363_s9 + $0x10] sm:$0xff] }
0x1cfc   :  { %v2155_v46 = vmul.f32 -1.442695, %v1531_v45 }
0x1cfe   :  { %2738 = vpow2.f32 %v2155_v46  ;;  %v1976_v46 = vld [vmem:[%s3363_s9 + $0x18] sm:$0xff] }
0x1cff   :  { %2740 = vtanh.f32 %v1531_v45 }
0x1d08   :  { %v2739_v47 = vpop.eup %2738 }
0x1d09   :  { %v1535_v48 = vadd.f32 1.0, %v2739_v47  ;;  %v2741_v8 = vpop.eup %2740  ;;  %v2636_v47 = vpack.c.bf16 %v1976_v46, %v1975_v49 }
0x1d0b   :  { %2742 = vrcp.f32 %v1535_v48 }
0x1d15   :  { %v2743_v53 = vpop.eup %2742 }
0x1d16   :  { %v1539_v25 = vsel %vm2943_vm6, %v2741_v8, %v2743_v53  ;;  %v1139_v8 = vadd.f32 %v3142_v22, %v3186_v11 }
0x1d17   :  { %1542 = vrot.lane.b32.xlu0 %v1539_v25, %s2781_s5  ;;  %v1540_v52 = vmul.f32 %v1539_v25, %v1449_v38 }
0x1d89   :  { %v1543_v57 = vpop.permute.xlu0 %1542 }
0x1d8a   :  { %v1545_v58 = vmul.f32 %v1543_v57, %v1539_v25 }
0x1d8c   :  { %1547 = vrot.lane.b32.xlu1 %v1545_v58, %s2782_s21 }
0x1dfe   :  { %v1548_v59 = vpop.permute.xlu1 %1547 }
0x1dff   :  { %v1550_v60 = vadd.f32 %v1548_v59, %v1540_v52 }
0x1e01   :  { %2744 = vtanh.f32 %v1550_v60 }
0x1e0b   :  { %v2745_v61 = vpop.eup %2744 }
0x1e0c   :  { %1553 = vrot.lane.b32.xlu0 %v2745_v61, %s2781_s5 }
0x1e7e   :  { %v1554_v62 = vpop.permute.xlu0 %1553 }
0x1e7f   :  { %v1556_v63 = vmul.f32 %v1554_v62, %v1539_v25 }
0x1e81   :  { %1558 = vrot.lane.b32.xlu1 %v1556_v63, %s2782_s21 }
0x1ef3   :  { %v3226_v0 = vpop.permute.xlu1 %1558 }
0x1ef4   :  { %2469 = vmatmul.mubr.msk.f32.vlgmr.msra.gmra.mrb[20].mxu0 %vm199_vm3, %v3226_v0 }
0x1ef5   :  { %2622 = vmatpush3.bf16.msra.mxu0 %v3100_v3  ;;  %2490 = vmatprep.mubr.msk.f32.mxu0 %vm2779_vm2, %v2780_v17 }
0x1ef6   :  { %2623 = vmatprep.subr.bf16.mxu0 %v2778_v14 }
0x1ef9   :  { %2625 = vmatpush3.bf16.msra.mxu0 %v3110_v20 }
0x1efa   :  { %2633 = vmatprep.subr.bf16.mxu0 %v2632_v41 }
0x1fc7   :  { %v1628_v2 = vpop.f32.mrb[20].mxu0 }
0x1fc8   :  { %v1632_v4 = vadd.f32 %v1628_v2, %v1129_v1  ;;  %v2470_v5 = vpop.f32.mrb[21].mxu0 }
0x1fca   :  { %v2157_v6 = vmul.f32 -1.442695, %v1632_v4 }
0x1fcc   :  { %2746 = vpow2.f32 %v2157_v6 }
0x1fcd   :  { %2748 = vtanh.f32 %v1632_v4 }
0x1fd6   :  { %v2747_v51 = vpop.eup %2746 }
0x1fd7   :  { %v1636_v7 = vadd.f32 1.0, %v2747_v51  ;;  %v2749_v12 = vpop.eup %2748 }
0x1fd9   :  { %2750 = vrcp.f32 %v1636_v7 }
0x1fe3   :  { %v2751_v13 = vpop.eup %2750 }
0x1fe4   :  { %v1640_v15 = vsel %vm2943_vm6, %v2749_v12, %v2751_v13 }
0x1fe5   :  { %1643 = vrot.lane.b32.xlu0 %v1640_v15, %s2781_s5  ;;  %v1641_v56 = vmul.f32 %v1640_v15, %v1550_v60 }
0x2057   :  { %v1644_v18 = vpop.permute.xlu0 %1643 }
0x2058   :  { %v1646_v21 = vmul.f32 %v1644_v18, %v1640_v15 }
0x205a   :  { %1648 = vrot.lane.b32.xlu1 %v1646_v21, %s2782_s21 }
0x20cc   :  { %v1649_v26 = vpop.permute.xlu1 %1648 }
0x20cd   :  { %v1651_v28 = vadd.f32 %v1649_v26, %v1641_v56 }
0x20cf   :  { %2752 = vtanh.f32 %v1651_v28 }
0x20d9   :  { %v2753_v9 = vpop.eup %2752 }
0x20da   :  { %1654 = vrot.lane.b32.xlu0 %v2753_v9, %s2781_s5 }
0x214c   :  { %v1655_v29 = vpop.permute.xlu0 %1654 }
0x214d   :  { %v1657_v30 = vmul.f32 %v1655_v29, %v1640_v15  ;;  %v1144_v29 = vadd.f32 %v3184_v10, %v3142_v22 }
0x214f   :  { %1659 = vrot.lane.b32.xlu1 %v1657_v30, %s2782_s21 }
0x21c1   :  { %v1660_v16 = vpop.permute.xlu1 %1659 }
0x21c2   :  { %2480 = vmatmul.mubr.msk.f32.vlgmr.msra.gmra.mrb[20].mxu1 %vm199_vm3, %v1660_v16 }
0x21c3   :  { %2628 = vmatpush3.bf16.msra.mxu1 %v3100_v3  ;;  %2501 = vmatprep.mubr.msk.f32.mxu1 %vm2779_vm2, %v2780_v17 }
0x21c4   :  { %2629 = vmatprep.subr.bf16.mxu1 %v2778_v14 }
0x21c7   :  { %2631 = vmatpush3.bf16.msra.mxu1 %v3110_v20 }
0x2295   :  { %v1729_v24 = vpop.f32.mrb[20].mxu1 }
0x2296   :  { %v1733_v31 = vadd.f32 %v1729_v24, %v1134_v23  ;;  %v2481_v19 = vpop.f32.mrb[21].mxu1 }
0x2298   :  { %v2159_v32 = vmul.f32 -1.442695, %v1733_v31 }
0x229a   :  { %2754 = vpow2.f32 %v2159_v32 }
0x229b   :  { %2756 = vtanh.f32 %v1733_v31 }
0x22a4   :  { %v2755_v33 = vpop.eup %2754 }
0x22a5   :  { %v1737_v34 = vadd.f32 1.0, %v2755_v33  ;;  %v2757_v3 = vpop.eup %2756 }
0x22a7   :  { %2758 = vrcp.f32 %v1737_v34 }
0x22b1   :  { %v2759_v37 = vpop.eup %2758 }
0x22b2   :  { %v1741_v17 = vsel %vm2943_vm6, %v2757_v3, %v2759_v37 }
0x22b3   :  { %1744 = vrot.lane.b32.xlu0 %v1741_v17, %s2781_s5  ;;  %v1742_v55 = vmul.f32 %v1741_v17, %v1651_v28 }
0x2325   :  { %v1745_v14 = vpop.permute.xlu0 %1744 }
0x2326   :  { %v1747_v20 = vmul.f32 %v1745_v14, %v1741_v17 }
0x2328   :  { %1749 = vrot.lane.b32.xlu1 %v1747_v20, %s2782_s21 }
0x239a   :  { %v1750_v36 = vpop.permute.xlu1 %1749 }
0x239b   :  { %v3255_v38 = vadd.f32 %v1750_v36, %v1742_v55 }
0x239d   :  { %2760 = vtanh.f32 %v3255_v38 }
0x23a7   :  { %v2761_v43 = vpop.eup %2760 }
0x23a8   :  { %1755 = vrot.lane.b32.xlu0 %v2761_v43, %s2781_s5 }
0x241a   :  { %v1756_v44 = vpop.permute.xlu0 %1755 }
0x241b   :  { %v1758_v45 = vmul.f32 %v1756_v44, %v1741_v17 }
0x241d   :  { %1760 = vrot.lane.b32.xlu1 %v1758_v45, %s2782_s21 }
0x248f   :  { %v1761_v48 = vpop.permute.xlu1 %1760 }
0x2490   :  { %2491 = vmatmul.mubr.msk.f32.vlgmr.msra.gmra.mrb[22].mxu0 %vm199_vm3, %v1761_v48 }
0x2491   :  { %2635 = vmatpush3.bf16.msra.mxu0 %v2632_v41  ;;  %2512 = vmatprep.mubr.msk.f32.mxu0 %vm199_vm3, %v3155_v50 }
0x2492   :  { %2637 = vmatprep.subr.bf16.mxu0 %v2636_v47 }
0x2495   :  { %2639 = vmatpush3.bf16.msra.mxu0 %v2636_v47 }
0x2498   :  { %2513 = vmatmul.mubr.msk.f32.vlgmr.msra.gmra.mrb[24].mxu0 %vm199_vm3, %v3190_v27  ;;  %v3288_v27 = vld [vmem:[%s3364_s10] ss:$0 sm:$0xff] }
0x2499   :  { %2515 = vmatprep.mubr.msk.f32.mxu0 %vm199_vm3, %v3208_v42 }
0x249c   :  { %2516 = vmatmul.mubr.msk.f32.gmra.mrb[26].mxu0 %vm199_vm3, %v3226_v0 }
0x249d   :  { %2518 = vmatprep.mubr.msk.f32.mxu0 %vm199_vm3, %v1660_v16 }
0x24a0   :  { %2519 = vmatmul.mubr.msk.f32.gmra.mrb[28].mxu0 %vm199_vm3, %v1761_v48 }
0x2563   :  { %v1830_v53 = vpop.f32.mrb[22].mxu0 }
0x2564   :  { %v1834_v50 = vadd.f32 %v1830_v53, %v1139_v8  ;;  %v2492_v25 = vpop.f32.mrb[23].mxu0 }
0x2566   :  { %v2161_v57 = vmul.f32 -1.442695, %v1834_v50 }
0x2568   :  { %2762 = vpow2.f32 %v2161_v57 }
0x2569   :  { %2764 = vtanh.f32 %v1834_v50 }
0x256b   :  { %v2514_v42 = vpop.f32.mrb[24].mxu0 }
0x256c   :  { %v2058_v58 = vadd.f32 %v2514_v42, %v3288_v27  ;;  %v2052_v52 = vpop.f32.mrb[25].mxu0 }
0x256d   :  { %v2053_v59 = vadd.f32 %v3288_v27, %v2052_v52 }
0x256e   :  { %2092 = vst [vmem:[%s3365_s11 + $0x8] sm:$0xff] %v2058_v58 }
0x256f   :  { %2091 = vst [vmem:[%s3365_s11] sm:$0xff] %v2053_v59  ;;  %v2517_v11 = vpop.f32.mrb[26].mxu0 }
0x2570   :  { %v2068_v60 = vadd.f32 %v2517_v11, %v3288_v27  ;;  %v2062_v61 = vpop.f32.mrb[27].mxu0 }
0x2571   :  { %v2063_v62 = vadd.f32 %v3288_v27, %v2062_v61 }
0x2572   :  { %v2763_v63 = vpop.eup %2762  ;;  %2094 = vst [vmem:[%s3365_s11 + $0x18] sm:$0xff] %v2068_v60 }
0x2573   :  { %v1838_v0 = vadd.f32 1.0, %v2763_v63  ;;  %2093 = vst [vmem:[%s3365_s11 + $0x10] sm:$0xff] %v2063_v62  ;;  %v2520_v1 = vpop.f32.mrb[28].mxu0  ;;  %v2765_v6 = vpop.eup %2764 }
0x2574   :  { %v2078_v2 = vadd.f32 %v2520_v1, %v3288_v27  ;;  %v2072_v4 = vpop.f32.mrb[29].mxu0 }
0x2575   :  { %2766 = vrcp.f32 %v1838_v0  ;;  %v2073_v5 = vadd.f32 %v3288_v27, %v2072_v4 }
0x2576   :  { %2096 = vst [vmem:[%s3365_s11 + $0x28] sm:$0xff] %v2078_v2 }
0x2577   :  { %2095 = vst [vmem:[%s3365_s11 + $0x20] sm:$0xff] %v2073_v5 }
0x257f   :  { %v2767_v51 = vpop.eup %2766 }
0x2580   :  { %v1842_v7 = vsel %vm2943_vm6, %v2765_v6, %v2767_v51 }
0x2581   :  { %1845 = vrot.lane.b32.xlu0 %v1842_v7, %s2781_s5  ;;  %v1843_v15 = vmul.f32 %v1842_v7, %v3255_v38 }
0x25f3   :  { %v1846_v12 = vpop.permute.xlu0 %1845 }
0x25f4   :  { %v1848_v13 = vmul.f32 %v1846_v12, %v1842_v7 }
0x25f6   :  { %1850 = vrot.lane.b32.xlu1 %v1848_v13, %s2782_s21 }
0x2668   :  { %v1851_v18 = vpop.permute.xlu1 %1850 }
0x2669   :  { %v1853_v21 = vadd.f32 %v1851_v18, %v1843_v15 }
0x266b   :  { %2768 = vtanh.f32 %v1853_v21 }
0x2675   :  { %v2769_v56 = vpop.eup %2768 }
0x2676   :  { %1856 = vrot.lane.b32.xlu0 %v2769_v56, %s2781_s5 }
0x26e8   :  { %v1857_v26 = vpop.permute.xlu0 %1856 }
0x26e9   :  { %v1859_v28 = vmul.f32 %v1857_v26, %v1842_v7 }
0x26eb   :  { %1861 = vrot.lane.b32.xlu1 %v1859_v28, %s2782_s21 }
0x275d   :  { %v1862_v9 = vpop.permute.xlu1 %1861 }
0x275e   :  { %2502 = vmatmul.mubr.msk.f32.vlgmr.msra.gmra.mrb[22].mxu1 %vm199_vm3, %v1862_v9  ;;  %2521 = vmatprep.mubr.msk.f32.mxu0 %vm199_vm3, %v1862_v9 }
0x2831   :  { %v1931_v30 = vpop.f32.mrb[22].mxu1 }
0x2832   :  { %v1935_v16 = vadd.f32 %v1931_v30, %v1144_v29  ;;  %v2503_v23 = vpop.f32.mrb[23].mxu1 }
0x2834   :  { %v2163_v24 = vmul.f32 -1.442695, %v1935_v16 }
0x2836   :  { %2770 = vpow2.f32 %v2163_v24 }
0x2837   :  { %2772 = vtanh.f32 %v1935_v16 }
0x2840   :  { %v2771_v31 = vpop.eup %2770 }
0x2841   :  { %v1939_v19 = vadd.f32 1.0, %v2771_v31  ;;  %v2773_v32 = vpop.eup %2772 }
0x2843   :  { %2774 = vrcp.f32 %v1939_v19 }
0x284d   :  { %v2775_v33 = vpop.eup %2774 }
0x284e   :  { %v1943_v34 = vsel %vm2943_vm6, %v2773_v32, %v2775_v33 }
0x284f   :  { %1946 = vrot.lane.b32.xlu0 %v1943_v34, %s2781_s5  ;;  %v1944_v22 = vmul.f32 %v1943_v34, %v1853_v21 }
0x28c1   :  { %v1947_v3 = vpop.permute.xlu0 %1946 }
0x28c2   :  { %v1949_v37 = vmul.f32 %v1947_v3, %v1943_v34 }
0x28c4   :  { %1951 = vrot.lane.b32.xlu1 %v1949_v37, %s2782_s21 }
0x2936   :  { %v1952_v10 = vpop.permute.xlu1 %1951 }
0x2937   :  { %v1954_v17 = vadd.f32 %v1952_v10, %v1944_v22 }
0x2939   :  { %2776 = vtanh.f32 %v1954_v17 }
0x2943   :  { %v2777_v14 = vpop.eup %2776 }
0x2944   :  { %1957 = vrot.lane.b32.xlu0 %v2777_v14, %s2781_s5 }
0x2948   :  { %1021 = vrot.lane.b32.xlu0 %v3164_v54, %s2783_s1 }
0x29b6   :  { %v1958_v20 = vpop.permute.xlu0 %1957 }
0x29b7   :  { %v1960_v55 = vmul.f32 %v1958_v20, %v1943_v34 }
0x29b9   :  { %1962 = vrot.lane.b32.xlu1 %v1960_v55, %s2782_s21 }
0x29ba   :  { %v1022_v35 = vpop.permute.xlu0 %1021 }
0x29bb   :  { %1024 = vst.msk [vmem:[%s3366_s13] sm:$0xff] %vm199_vm3, %v1022_v35 }
0x29bd   :  { %1968 = vrot.lane.b32.xlu1 %v1954_v17, %s2783_s1 }
0x2a2b   :  { %v1963_v36 = vpop.permute.xlu1 %1962 }
0x2a2c   :  { %2164 = vst.msk [vmem:[%s3362_s12 + $0x8] sm:$0xff] %vm199_vm3, %v1963_v36  ;;  %2522 = vmatmul.mubr.msk.f32.gmra.mrb[30].mxu0 %vm199_vm3, %v1963_v36 }
0x2a2f   :  { %v1969_v54 = vpop.permute.xlu1 %1968 }
0x2a30   :  { %2165 = vst.msk [vmem:[%s3366_s13 + $0x8] sm:$0xff] %vm199_vm3, %v1969_v54 }
0x2aff   :  { %v2523_v38 = vpop.f32.mrb[30].mxu0 }
0x2b00   :  { %v2088_v39 = vadd.f32 %v2523_v38, %v3288_v27  ;;  %v2082_v40 = vpop.f32.mrb[31].mxu0 }
0x2b01   :  { %v2083_v41 = vadd.f32 %v3288_v27, %v2082_v40 }
0x2b02   :  { %2098 = vst [vmem:[%s3365_s11 + $0x38] sm:$0xff] %v2088_v39 }
0x2b03   :  { %2097 = vst [vmem:[%s3365_s11 + $0x30] sm:$0xff] %v2083_v41 }

</bundles_post_ra>
